<compile_context>
chip_gen: v6e
topology: v6e:2x2x1
jax: 0.10.0
libtpu: 0.0.40
codegen_flags: <defaults>
</compile_context>

<pallas_src>
import functools

import jax
import jax.numpy as jnp
from jax import lax
from jax.experimental import pallas as pl
from jax.experimental.pallas import tpu as pltpu

# ----------------------------- configuration (small) -----------------------------
BS = 2
IMG_F_DIM = 4
IMG_SIZE = 16
GRID_SIZE = 8
GRID_F_DIM = 32
N_HEADS = 4

PATCH = IMG_SIZE // GRID_SIZE              # 2
SEQ = GRID_SIZE * GRID_SIZE                # 64
K_IN = IMG_F_DIM * PATCH * PATCH           # 16  (flattened patch: c, ph, pw)
D_HEAD = GRID_F_DIM // N_HEADS             # 8
FF_HID = GRID_F_DIM                        # PositionwiseFeedForward hidden = hid_dim
EPS = 1e-6
N_TOK = BS * SEQ                           # 128 tokens (batch-major) on the lane axis


# --------------------------------- Pallas kernel ---------------------------------
def _img_feat_to_grid_kernel(
    patches_ref, pos_ref, wp_ref, wall_ref, small_ref, out_ref,
    *, bs, seq, d_model, n_heads, d_head,
):
    # Everything below is feature-major: [features (sublanes), tokens (lanes)].
    x = patches_ref[...]                                   # [K, N]  = [16, 128]
    wall = wall_ref[...]                                   # [6D, D] = [192, 32]
    small = small_ref[...]                                 # [D, 8]

    col = lambda c: small[:, c:c + 1]                      # [D, 1] — broadcasts along lanes
    bp, ln1g, ln1b, b1, b2, ln2g, ln2b = (col(c) for c in range(7))

    # Patch projection == Conv2d(k=stride=patch) as a matmul, ReLU, + position embedding
    # (pos embedding is pre-tiled to [D, N] at pack time; no in-kernel concat).
    g = jnp.dot(wp_ref[...], x, preferred_element_type=jnp.float32) + bp   # [D, N]
    g = jnp.maximum(g, 0.0) + pos_ref[...]                                  # [D, N]

    wqkv = wall[0:3 * d_model, :]                          # rows: wq^T | wk^T | wv^T
    wo = wall[3 * d_model:4 * d_model, :]                  # un-transposed: row h*dh.. is head h
    w1t = wall[4 * d_model:5 * d_model, :]
    w2t = wall[5 * d_model:6 * d_model, :]

    # Fused q/k/v projection (q already scaled by 1/sqrt(d_head) at pack time).
    qkv = jnp.dot(wqkv, g, preferred_element_type=jnp.float32)             # [3D, N]

    tt = (((0,), (0,)), ((), ()))      # contract the sublane (feature) dims: lhs^T @ rhs

    # Per-(batch, head) attention on [64, 64] key-by-query blocks — no cross-batch masking.
    # Static Python loops: the live set per iteration is ~12 small vregs, so no spill risk.
    per_batch = []
    for b in range(bs):
        t0 = b * seq
        acc = jnp.zeros((d_model, seq), jnp.float32)       # wo-projected attention output
        for h in range(n_heads):
            f0 = h * d_head
            q = qkv[f0:f0 + d_head, t0:t0 + seq]                               # [dh, S]
            k = qkv[d_model + f0:d_model + f0 + d_head, t0:t0 + seq]           # [dh, S]
            v = qkv[2 * d_model + f0:2 * d_model + f0 + d_head, t0:t0 + seq]   # [dh, S]

            # sT[key, query] so the softmax reductions are sublane reductions and the
            # [1, S_q] stats broadcast naturally onto the feature-major PV output.
            sT = lax.dot_general(k, q, tt, preferred_element_type=jnp.float32)  # [S, S]
            sT = sT - jnp.max(sT, axis=0, keepdims=True)
            pT = jnp.exp(sT)                                                    # unnormalized
            denom = jnp.sum(pT, axis=0, keepdims=True)                          # [1, S]

            o_h = jnp.dot(v, pT, preferred_element_type=jnp.float32)            # [dh, S]
            o_h = o_h * pl.reciprocal(denom, approx=False)                      # post-PV norm
            # Fuse the output projection per head (sublane row-slice of wo).
            acc = acc + lax.dot_general(wo[f0:f0 + d_head, :], o_h, tt,
                                        preferred_element_type=jnp.float32)     # [D, S]
        per_batch.append(acc)
    o = jnp.concatenate(per_batch, axis=1)                 # [D, N] — single lane concat

    # Residual + LayerNorm 1 (feature axis = sublanes); dropout == identity.
    x1 = o + g
    mu1 = jnp.mean(x1, axis=0, keepdims=True)
    var1 = jnp.mean((x1 - mu1) ** 2, axis=0, keepdims=True)
    x1 = (x1 - mu1) * lax.rsqrt(var1 + EPS) * ln1g + ln1b

    # Position-wise feed-forward + residual + LayerNorm 2.
    h1 = jnp.maximum(jnp.dot(w1t, x1, preferred_element_type=jnp.float32) + b1, 0.0)
    h2 = jnp.dot(w2t, h1, preferred_element_type=jnp.float32) + b2
    x2 = h2 + x1
    mu2 = jnp.mean(x2, axis=0, keepdims=True)
    var2 = jnp.mean((x2 - mu2) ** 2, axis=0, keepdims=True)
    x2 = (x2 - mu2) * lax.rsqrt(var2 + EPS) * ln2g + ln2b

    out_ref[...] = x2.astype(out_ref.dtype)                # lane-dense [32, 128] store


# --------------------------------- wrapper ---------------------------------
def pack_params(p):
    """One-time packing of the module parameters into DMA- and layout-friendly slabs."""
    inv_temp = 1.0 / (float(D_HEAD) ** 0.5)
    wp = p["w_conv"].reshape(GRID_F_DIM, K_IN)             # [D, K], (c, ph, pw) flatten order
    wall = jnp.concatenate(
        [(p["wq"] * inv_temp).T,        # temperature pre-folded into the q projection
         p["wk"].T, p["wv"].T,
         p["wo"],                       # un-transposed: per-head rows h*dh:(h+1)*dh
         p["w1"].T, p["w2"].T], axis=0)                    # [6D, D] = [192, 32]
    small = jnp.stack(
        [p["b_conv"], p["ln1_g"], p["ln1_b"], p["b1"], p["b2"],
         p["ln2_g"], p["ln2_b"], jnp.zeros_like(p["b_conv"])], axis=1)   # [D, 8]
    pos_fm = jnp.tile(p["pos"].T, (1, BS))                 # [D, BS*SEQ] pre-tiled
    return {"pos": pos_fm, "wp": wp, "wall": wall, "small": small}


def img_feat_to_grid_pallas(img, packed):
    bs, c, hh, ww = img.shape
    assert (c, hh, ww) == (IMG_F_DIM, IMG_SIZE, IMG_SIZE)
    assert bs == BS

    # Glue: NCHW -> feature-major patches [C*P*P, bs*SEQ]; K ordering (c, ph, pw) matches
    # torch Conv2d weight.reshape(out, C*P*P); token ordering is (b, gy, gx).
    patches = img.reshape(bs, c, GRID_SIZE, PATCH, GRID_SIZE, PATCH)
    patches = patches.transpose(1, 3, 5, 0, 2, 4).reshape(K_IN, bs * SEQ)

    kernel = functools.partial(
        _img_feat_to_grid_kernel,
        bs=BS, seq=SEQ, d_model=GRID_F_DIM, n_heads=N_HEADS, d_head=D_HEAD)

    full = lambda shape: pl.BlockSpec(shape, lambda i: (0, 0))

    # Single grid step: total resident data ~100 KiB -> one DMA per operand and one
    # lane-dense output store.  (For multi-frame batching, add a leading "parallel" grid
    # axis so Mosaic can shard the steps across v7x's two TensorCores.)
    out = pl.pallas_call(
        kernel,
        out_shape=jax.ShapeDtypeStruct((GRID_F_DIM, N_TOK), jnp.float32),
        grid_spec=pl.GridSpec(
            grid=(1,),
            in_specs=[
                full((K_IN, N_TOK)),                    # patches          [16, 128]
                full((GRID_F_DIM, N_TOK)),              # pos emb (tiled)  [32, 128]
                full((GRID_F_DIM, K_IN)),               # conv weight      [32, 16]
                full((6 * GRID_F_DIM, GRID_F_DIM)),     # packed weights   [192, 32]
                full((GRID_F_DIM, 8)),                  # packed vectors   [32, 8]
            ],
            out_specs=full((GRID_F_DIM, N_TOK)),        # [32, 128] feature-major
        ),
        compiler_params=pltpu.CompilerParams(dimension_semantics=("arbitrary",)),
    )(patches, packed["pos"], packed["wp"], packed["wall"], packed["small"])

    return out.T.reshape(BS, SEQ, GRID_F_DIM)


# ------------------------------ pure-JAX reference ------------------------------
def _layernorm(x, g, b):
    mu = jnp.mean(x, axis=-1, keepdims=True)
    var = jnp.mean((x - mu) ** 2, axis=-1, keepdims=True)
    return (x - mu) / jnp.sqrt(var + EPS) * g + b


def img_feat_to_grid_reference(img, p):
    conv = lax.conv_general_dilated(
        img, p["w_conv"], window_strides=(PATCH, PATCH), padding="VALID",
        dimension_numbers=("NCHW", "OIHW", "NCHW"))
    conv = conv + p["b_conv"][None, :, None, None]
    g = jax.nn.relu(conv).reshape(BS, GRID_F_DIM, SEQ).transpose(0, 2, 1)
    g = g + p["pos"][None]

    q = g @ p["wq"]; k = g @ p["wk"]; v = g @ p["wv"]
    qh = q.reshape(BS, SEQ, N_HEADS, D_HEAD).transpose(0, 2, 1, 3)
    kh = k.reshape(BS, SEQ, N_HEADS, D_HEAD).transpose(0, 2, 1, 3)
    vh = v.reshape(BS, SEQ, N_HEADS, D_HEAD).transpose(0, 2, 1, 3)
    attn = jax.nn.softmax((qh / (D_HEAD ** 0.5)) @ kh.transpose(0, 1, 3, 2), axis=-1)
    o = (attn @ vh).transpose(0, 2, 1, 3).reshape(BS, SEQ, GRID_F_DIM)
    x1 = _layernorm(o @ p["wo"] + g, p["ln1_g"], p["ln1_b"])
    x2 = jax.nn.relu(x1 @ p["w1"] + p["b1"]) @ p["w2"] + p["b2"] + x1
    return _layernorm(x2, p["ln2_g"], p["ln2_b"])


# ----------------------------------- main -----------------------------------
def _init_params(key):
    ks = jax.random.split(key, 12)
    n = lambda k, shape, s=0.05: (jax.random.normal(k, shape, jnp.float32) * s)
    return {
        "pos":    n(ks[0], (SEQ, GRID_F_DIM)),
        "w_conv": n(ks[1], (GRID_F_DIM, IMG_F_DIM, PATCH, PATCH)),
        "b_conv": n(ks[2], (GRID_F_DIM,)),
        "wq":     n(ks[3], (GRID_F_DIM, GRID_F_DIM)),
        "wk":     n(ks[4], (GRID_F_DIM, GRID_F_DIM)),
        "wv":     n(ks[5], (GRID_F_DIM, GRID_F_DIM)),
        "wo":     n(ks[6], (GRID_F_DIM, GRID_F_DIM)),
        "ln1_g":  jnp.ones((GRID_F_DIM,), jnp.float32),
        "ln1_b":  jnp.zeros((GRID_F_DIM,), jnp.float32),
        "w1":     n(ks[7], (GRID_F_DIM, FF_HID)),
        "b1":     n(ks[8], (FF_HID,)),
        "w2":     n(ks[9], (FF_HID, GRID_F_DIM)),
        "b2":     n(ks[10], (GRID_F_DIM,)),
        "ln2_g":  jnp.ones((GRID_F_DIM,), jnp.float32),
        "ln2_b":  jnp.zeros((GRID_F_DIM,), jnp.float32),
    }


if __name__ == "__main__":
    key = jax.random.PRNGKey(0)
    k_img, k_par = jax.random.split(key)
    img = jax.random.normal(k_img, (BS, IMG_F_DIM, IMG_SIZE, IMG_SIZE), jnp.float32)
    params = _init_params(k_par)
    packed = pack_params(params)            # one-time weight packing (outside the kernel)

    out = jax.block_until_ready(img_feat_to_grid_pallas(img, packed))
    ref = jax.block_until_ready(img_feat_to_grid_reference(img, params))

    assert out.shape == (BS, SEQ, GRID_F_DIM), out.shape
    assert jnp.allclose(out, ref, atol=1e-4, rtol=1e-4), float(jnp.max(jnp.abs(out - ref)))
    print("KERNEL_OK")
</pallas_src>

<mosaic_0001>
module attributes {stable_mosaic.version = 11 : i64} {
  func.func @_img_feat_to_grid_kernel(%arg0: i32, %arg1: memref<16x128xf32, #tpu.memory_space<vmem>>, %arg2: memref<32x128xf32, #tpu.memory_space<vmem>>, %arg3: memref<32x16xf32, #tpu.memory_space<vmem>>, %arg4: memref<192x32xf32, #tpu.memory_space<vmem>>, %arg5: memref<32x8xf32, #tpu.memory_space<vmem>>, %arg6: memref<32x128xf32, #tpu.memory_space<vmem>>) attributes {dimension_semantics = [#tpu.dimension_semantics<arbitrary>], iteration_bounds = array<i64: 1>, scalar_prefetch = 0 : i64, scratch_operands = 0 : i64, tpu.core_type = #tpu.core_type<tc>, window_params = [{pipeline_mode = #tpu.pipeline_mode<synchronous>, transform_indices = @transform_0, window_bounds = array<i64: 16, 128>}, {pipeline_mode = #tpu.pipeline_mode<synchronous>, transform_indices = @transform_1, window_bounds = array<i64: 32, 128>}, {pipeline_mode = #tpu.pipeline_mode<synchronous>, transform_indices = @transform_2, window_bounds = array<i64: 32, 16>}, {pipeline_mode = #tpu.pipeline_mode<synchronous>, transform_indices = @transform_3, window_bounds = array<i64: 192, 32>}, {pipeline_mode = #tpu.pipeline_mode<synchronous>, transform_indices = @transform_4, window_bounds = array<i64: 32, 8>}, {pipeline_mode = #tpu.pipeline_mode<synchronous>, transform_indices = @transform_5, window_bounds = array<i64: 32, 128>}]} {
    %c0 = arith.constant 0 : index
    %c0_0 = arith.constant 0 : index
    %0 = vector.load %arg1[%c0, %c0_0] : memref<16x128xf32, #tpu.memory_space<vmem>>, vector<16x128xf32>
    %c0_1 = arith.constant 0 : index
    %c0_2 = arith.constant 0 : index
    %1 = vector.load %arg4[%c0_1, %c0_2] : memref<192x32xf32, #tpu.memory_space<vmem>>, vector<192x32xf32>
    %c0_3 = arith.constant 0 : index
    %c0_4 = arith.constant 0 : index
    %2 = vector.load %arg5[%c0_3, %c0_4] : memref<32x8xf32, #tpu.memory_space<vmem>>, vector<32x8xf32>
    %3 = vector.extract_strided_slice %2 {offsets = [0, 0], sizes = [32, 1], strides = [1, 1]} : vector<32x8xf32> to vector<32x1xf32>
    %4 = vector.extract_strided_slice %2 {offsets = [0, 1], sizes = [32, 1], strides = [1, 1]} : vector<32x8xf32> to vector<32x1xf32>
    %5 = vector.extract_strided_slice %2 {offsets = [0, 2], sizes = [32, 1], strides = [1, 1]} : vector<32x8xf32> to vector<32x1xf32>
    %6 = vector.extract_strided_slice %2 {offsets = [0, 3], sizes = [32, 1], strides = [1, 1]} : vector<32x8xf32> to vector<32x1xf32>
    %7 = vector.extract_strided_slice %2 {offsets = [0, 4], sizes = [32, 1], strides = [1, 1]} : vector<32x8xf32> to vector<32x1xf32>
    %8 = vector.extract_strided_slice %2 {offsets = [0, 5], sizes = [32, 1], strides = [1, 1]} : vector<32x8xf32> to vector<32x1xf32>
    %9 = vector.extract_strided_slice %2 {offsets = [0, 6], sizes = [32, 1], strides = [1, 1]} : vector<32x8xf32> to vector<32x1xf32>
    %c0_5 = arith.constant 0 : index
    %c0_6 = arith.constant 0 : index
    %10 = vector.load %arg3[%c0_5, %c0_6] : memref<32x16xf32, #tpu.memory_space<vmem>>, vector<32x16xf32>
    %cst = arith.constant dense<0.000000e+00> : vector<32x128xf32>
    %11 = tpu.matmul %10, %0, %cst {dimension_numbers = #tpu.dot_dimension_numbers<[1], [0], [0], [1], [0, 0, 1, 1], [], []>} : vector<32x16xf32>, vector<16x128xf32>, vector<32x128xf32> -> vector<32x128xf32>
    %12 = vector.broadcast %3 : vector<32x1xf32> to vector<32x128xf32>
    %13 = arith.addf %11, %12 : vector<32x128xf32>
    %cst_7 = arith.constant 0.000000e+00 : f32
    %14 = vector.broadcast %cst_7 : f32 to vector<32x128xf32>
    %15 = arith.maximumf %13, %14 : vector<32x128xf32>
    %c0_8 = arith.constant 0 : index
    %c0_9 = arith.constant 0 : index
    %16 = vector.load %arg2[%c0_8, %c0_9] : memref<32x128xf32, #tpu.memory_space<vmem>>, vector<32x128xf32>
    %17 = arith.addf %15, %16 : vector<32x128xf32>
    %18 = vector.extract_strided_slice %1 {offsets = [0, 0], sizes = [96, 32], strides = [1, 1]} : vector<192x32xf32> to vector<96x32xf32>
    %19 = vector.extract_strided_slice %1 {offsets = [96, 0], sizes = [32, 32], strides = [1, 1]} : vector<192x32xf32> to vector<32x32xf32>
    %20 = vector.extract_strided_slice %1 {offsets = [128, 0], sizes = [32, 32], strides = [1, 1]} : vector<192x32xf32> to vector<32x32xf32>
    %21 = vector.extract_strided_slice %1 {offsets = [160, 0], sizes = [32, 32], strides = [1, 1]} : vector<192x32xf32> to vector<32x32xf32>
    %cst_10 = arith.constant dense<0.000000e+00> : vector<96x128xf32>
    %22 = tpu.matmul %18, %17, %cst_10 {dimension_numbers = #tpu.dot_dimension_numbers<[1], [0], [0], [1], [0, 0, 1, 1], [], []>} : vector<96x32xf32>, vector<32x128xf32>, vector<96x128xf32> -> vector<96x128xf32>
    %cst_11 = arith.constant 0.000000e+00 : f32
    %23 = vector.broadcast %cst_11 : f32 to vector<32x64xf32>
    %24 = vector.extract_strided_slice %22 {offsets = [0, 0], sizes = [8, 64], strides = [1, 1]} : vector<96x128xf32> to vector<8x64xf32>
    %25 = vector.extract_strided_slice %22 {offsets = [32, 0], sizes = [8, 64], strides = [1, 1]} : vector<96x128xf32> to vector<8x64xf32>
    %26 = vector.extract_strided_slice %22 {offsets = [64, 0], sizes = [8, 64], strides = [1, 1]} : vector<96x128xf32> to vector<8x64xf32>
    %cst_12 = arith.constant dense<0.000000e+00> : vector<64x64xf32>
    %27 = tpu.matmul %25, %24, %cst_12 {dimension_numbers = #tpu.dot_dimension_numbers<[0], [0], [1], [1], [0, 1, 1, 1], [], []>} : vector<8x64xf32>, vector<8x64xf32>, vector<64x64xf32> -> vector<64x64xf32>
    %cst_13 = arith.constant dense<0xFF800000> : vector<64xf32>
    %28 = vector.multi_reduction <maximumf>, %27, %cst_13 [0] : vector<64x64xf32> to vector<64xf32>
    %29 = vector.shape_cast %28 : vector<64xf32> to vector<1x64xf32>
    %30 = vector.broadcast %29 : vector<1x64xf32> to vector<64x64xf32>
    %31 = arith.subf %27, %30 : vector<64x64xf32>
    %32 = math.exp %31 : vector<64x64xf32>
    %cst_14 = arith.constant dense<0.000000e+00> : vector<64xf32>
    %33 = vector.multi_reduction <add>, %32, %cst_14 [0] : vector<64x64xf32> to vector<64xf32>
    %34 = vector.shape_cast %33 : vector<64xf32> to vector<1x64xf32>
    %cst_15 = arith.constant dense<0.000000e+00> : vector<8x64xf32>
    %35 = tpu.matmul %26, %32, %cst_15 {dimension_numbers = #tpu.dot_dimension_numbers<[1], [0], [0], [1], [0, 0, 1, 1], [], []>} : vector<8x64xf32>, vector<64x64xf32>, vector<8x64xf32> -> vector<8x64xf32>
    %36 = tpu.reciprocal %34 : vector<1x64xf32> -> vector<1x64xf32>
    %37 = vector.broadcast %36 : vector<1x64xf32> to vector<8x64xf32>
    %38 = arith.mulf %35, %37 : vector<8x64xf32>
    %39 = vector.extract_strided_slice %19 {offsets = [0, 0], sizes = [8, 32], strides = [1, 1]} : vector<32x32xf32> to vector<8x32xf32>
    %cst_16 = arith.constant dense<0.000000e+00> : vector<32x64xf32>
    %40 = tpu.matmul %39, %38, %cst_16 {dimension_numbers = #tpu.dot_dimension_numbers<[0], [0], [1], [1], [0, 1, 1, 1], [], []>} : vector<8x32xf32>, vector<8x64xf32>, vector<32x64xf32> -> vector<32x64xf32>
    %41 = arith.addf %23, %40 : vector<32x64xf32>
    %42 = vector.extract_strided_slice %22 {offsets = [8, 0], sizes = [8, 64], strides = [1, 1]} : vector<96x128xf32> to vector<8x64xf32>
    %43 = vector.extract_strided_slice %22 {offsets = [40, 0], sizes = [8, 64], strides = [1, 1]} : vector<96x128xf32> to vector<8x64xf32>
    %44 = vector.extract_strided_slice %22 {offsets = [72, 0], sizes = [8, 64], strides = [1, 1]} : vector<96x128xf32> to vector<8x64xf32>
    %cst_17 = arith.constant dense<0.000000e+00> : vector<64x64xf32>
    %45 = tpu.matmul %43, %42, %cst_17 {dimension_numbers = #tpu.dot_dimension_numbers<[0], [0], [1], [1], [0, 1, 1, 1], [], []>} : vector<8x64xf32>, vector<8x64xf32>, vector<64x64xf32> -> vector<64x64xf32>
    %cst_18 = arith.constant dense<0xFF800000> : vector<64xf32>
    %46 = vector.multi_reduction <maximumf>, %45, %cst_18 [0] : vector<64x64xf32> to vector<64xf32>
    %47 = vector.shape_cast %46 : vector<64xf32> to vector<1x64xf32>
    %48 = vector.broadcast %47 : vector<1x64xf32> to vector<64x64xf32>
    %49 = arith.subf %45, %48 : vector<64x64xf32>
    %50 = math.exp %49 : vector<64x64xf32>
    %cst_19 = arith.constant dense<0.000000e+00> : vector<64xf32>
    %51 = vector.multi_reduction <add>, %50, %cst_19 [0] : vector<64x64xf32> to vector<64xf32>
    %52 = vector.shape_cast %51 : vector<64xf32> to vector<1x64xf32>
    %cst_20 = arith.constant dense<0.000000e+00> : vector<8x64xf32>
    %53 = tpu.matmul %44, %50, %cst_20 {dimension_numbers = #tpu.dot_dimension_numbers<[1], [0], [0], [1], [0, 0, 1, 1], [], []>} : vector<8x64xf32>, vector<64x64xf32>, vector<8x64xf32> -> vector<8x64xf32>
    %54 = tpu.reciprocal %52 : vector<1x64xf32> -> vector<1x64xf32>
    %55 = vector.broadcast %54 : vector<1x64xf32> to vector<8x64xf32>
    %56 = arith.mulf %53, %55 : vector<8x64xf32>
    %57 = vector.extract_strided_slice %19 {offsets = [8, 0], sizes = [8, 32], strides = [1, 1]} : vector<32x32xf32> to vector<8x32xf32>
    %cst_21 = arith.constant dense<0.000000e+00> : vector<32x64xf32>
    %58 = tpu.matmul %57, %56, %cst_21 {dimension_numbers = #tpu.dot_dimension_numbers<[0], [0], [1], [1], [0, 1, 1, 1], [], []>} : vector<8x32xf32>, vector<8x64xf32>, vector<32x64xf32> -> vector<32x64xf32>
    %59 = arith.addf %41, %58 : vector<32x64xf32>
    %60 = vector.extract_strided_slice %22 {offsets = [16, 0], sizes = [8, 64], strides = [1, 1]} : vector<96x128xf32> to vector<8x64xf32>
    %61 = vector.extract_strided_slice %22 {offsets = [48, 0], sizes = [8, 64], strides = [1, 1]} : vector<96x128xf32> to vector<8x64xf32>
    %62 = vector.extract_strided_slice %22 {offsets = [80, 0], sizes = [8, 64], strides = [1, 1]} : vector<96x128xf32> to vector<8x64xf32>
    %cst_22 = arith.constant dense<0.000000e+00> : vector<64x64xf32>
    %63 = tpu.matmul %61, %60, %cst_22 {dimension_numbers = #tpu.dot_dimension_numbers<[0], [0], [1], [1], [0, 1, 1, 1], [], []>} : vector<8x64xf32>, vector<8x64xf32>, vector<64x64xf32> -> vector<64x64xf32>
    %cst_23 = arith.constant dense<0xFF800000> : vector<64xf32>
    %64 = vector.multi_reduction <maximumf>, %63, %cst_23 [0] : vector<64x64xf32> to vector<64xf32>
    %65 = vector.shape_cast %64 : vector<64xf32> to vector<1x64xf32>
    %66 = vector.broadcast %65 : vector<1x64xf32> to vector<64x64xf32>
    %67 = arith.subf %63, %66 : vector<64x64xf32>
    %68 = math.exp %67 : vector<64x64xf32>
    %cst_24 = arith.constant dense<0.000000e+00> : vector<64xf32>
    %69 = vector.multi_reduction <add>, %68, %cst_24 [0] : vector<64x64xf32> to vector<64xf32>
    %70 = vector.shape_cast %69 : vector<64xf32> to vector<1x64xf32>
    %cst_25 = arith.constant dense<0.000000e+00> : vector<8x64xf32>
    %71 = tpu.matmul %62, %68, %cst_25 {dimension_numbers = #tpu.dot_dimension_numbers<[1], [0], [0], [1], [0, 0, 1, 1], [], []>} : vector<8x64xf32>, vector<64x64xf32>, vector<8x64xf32> -> vector<8x64xf32>
    %72 = tpu.reciprocal %70 : vector<1x64xf32> -> vector<1x64xf32>
    %73 = vector.broadcast %72 : vector<1x64xf32> to vector<8x64xf32>
    %74 = arith.mulf %71, %73 : vector<8x64xf32>
    %75 = vector.extract_strided_slice %19 {offsets = [16, 0], sizes = [8, 32], strides = [1, 1]} : vector<32x32xf32> to vector<8x32xf32>
    %cst_26 = arith.constant dense<0.000000e+00> : vector<32x64xf32>
    %76 = tpu.matmul %75, %74, %cst_26 {dimension_numbers = #tpu.dot_dimension_numbers<[0], [0], [1], [1], [0, 1, 1, 1], [], []>} : vector<8x32xf32>, vector<8x64xf32>, vector<32x64xf32> -> vector<32x64xf32>
    %77 = arith.addf %59, %76 : vector<32x64xf32>
    %78 = vector.extract_strided_slice %22 {offsets = [24, 0], sizes = [8, 64], strides = [1, 1]} : vector<96x128xf32> to vector<8x64xf32>
    %79 = vector.extract_strided_slice %22 {offsets = [56, 0], sizes = [8, 64], strides = [1, 1]} : vector<96x128xf32> to vector<8x64xf32>
    %80 = vector.extract_strided_slice %22 {offsets = [88, 0], sizes = [8, 64], strides = [1, 1]} : vector<96x128xf32> to vector<8x64xf32>
    %cst_27 = arith.constant dense<0.000000e+00> : vector<64x64xf32>
    %81 = tpu.matmul %79, %78, %cst_27 {dimension_numbers = #tpu.dot_dimension_numbers<[0], [0], [1], [1], [0, 1, 1, 1], [], []>} : vector<8x64xf32>, vector<8x64xf32>, vector<64x64xf32> -> vector<64x64xf32>
    %cst_28 = arith.constant dense<0xFF800000> : vector<64xf32>
    %82 = vector.multi_reduction <maximumf>, %81, %cst_28 [0] : vector<64x64xf32> to vector<64xf32>
    %83 = vector.shape_cast %82 : vector<64xf32> to vector<1x64xf32>
    %84 = vector.broadcast %83 : vector<1x64xf32> to vector<64x64xf32>
    %85 = arith.subf %81, %84 : vector<64x64xf32>
    %86 = math.exp %85 : vector<64x64xf32>
    %cst_29 = arith.constant dense<0.000000e+00> : vector<64xf32>
    %87 = vector.multi_reduction <add>, %86, %cst_29 [0] : vector<64x64xf32> to vector<64xf32>
    %88 = vector.shape_cast %87 : vector<64xf32> to vector<1x64xf32>
    %cst_30 = arith.constant dense<0.000000e+00> : vector<8x64xf32>
    %89 = tpu.matmul %80, %86, %cst_30 {dimension_numbers = #tpu.dot_dimension_numbers<[1], [0], [0], [1], [0, 0, 1, 1], [], []>} : vector<8x64xf32>, vector<64x64xf32>, vector<8x64xf32> -> vector<8x64xf32>
    %90 = tpu.reciprocal %88 : vector<1x64xf32> -> vector<1x64xf32>
    %91 = vector.broadcast %90 : vector<1x64xf32> to vector<8x64xf32>
    %92 = arith.mulf %89, %91 : vector<8x64xf32>
    %93 = vector.extract_strided_slice %19 {offsets = [24, 0], sizes = [8, 32], strides = [1, 1]} : vector<32x32xf32> to vector<8x32xf32>
    %cst_31 = arith.constant dense<0.000000e+00> : vector<32x64xf32>
    %94 = tpu.matmul %93, %92, %cst_31 {dimension_numbers = #tpu.dot_dimension_numbers<[0], [0], [1], [1], [0, 1, 1, 1], [], []>} : vector<8x32xf32>, vector<8x64xf32>, vector<32x64xf32> -> vector<32x64xf32>
    %95 = arith.addf %77, %94 : vector<32x64xf32>
    %cst_32 = arith.constant 0.000000e+00 : f32
    %96 = vector.broadcast %cst_32 : f32 to vector<32x64xf32>
    %97 = vector.extract_strided_slice %22 {offsets = [0, 64], sizes = [8, 64], strides = [1, 1]} : vector<96x128xf32> to vector<8x64xf32>
    %98 = vector.extract_strided_slice %22 {offsets = [32, 64], sizes = [8, 64], strides = [1, 1]} : vector<96x128xf32> to vector<8x64xf32>
    %99 = vector.extract_strided_slice %22 {offsets = [64, 64], sizes = [8, 64], strides = [1, 1]} : vector<96x128xf32> to vector<8x64xf32>
    %cst_33 = arith.constant dense<0.000000e+00> : vector<64x64xf32>
    %100 = tpu.matmul %98, %97, %cst_33 {dimension_numbers = #tpu.dot_dimension_numbers<[0], [0], [1], [1], [0, 1, 1, 1], [], []>} : vector<8x64xf32>, vector<8x64xf32>, vector<64x64xf32> -> vector<64x64xf32>
    %cst_34 = arith.constant dense<0xFF800000> : vector<64xf32>
    %101 = vector.multi_reduction <maximumf>, %100, %cst_34 [0] : vector<64x64xf32> to vector<64xf32>
    %102 = vector.shape_cast %101 : vector<64xf32> to vector<1x64xf32>
    %103 = vector.broadcast %102 : vector<1x64xf32> to vector<64x64xf32>
    %104 = arith.subf %100, %103 : vector<64x64xf32>
    %105 = math.exp %104 : vector<64x64xf32>
    %cst_35 = arith.constant dense<0.000000e+00> : vector<64xf32>
    %106 = vector.multi_reduction <add>, %105, %cst_35 [0] : vector<64x64xf32> to vector<64xf32>
    %107 = vector.shape_cast %106 : vector<64xf32> to vector<1x64xf32>
    %cst_36 = arith.constant dense<0.000000e+00> : vector<8x64xf32>
    %108 = tpu.matmul %99, %105, %cst_36 {dimension_numbers = #tpu.dot_dimension_numbers<[1], [0], [0], [1], [0, 0, 1, 1], [], []>} : vector<8x64xf32>, vector<64x64xf32>, vector<8x64xf32> -> vector<8x64xf32>
    %109 = tpu.reciprocal %107 : vector<1x64xf32> -> vector<1x64xf32>
    %110 = vector.broadcast %109 : vector<1x64xf32> to vector<8x64xf32>
    %111 = arith.mulf %108, %110 : vector<8x64xf32>
    %112 = vector.extract_strided_slice %19 {offsets = [0, 0], sizes = [8, 32], strides = [1, 1]} : vector<32x32xf32> to vector<8x32xf32>
    %cst_37 = arith.constant dense<0.000000e+00> : vector<32x64xf32>
    %113 = tpu.matmul %112, %111, %cst_37 {dimension_numbers = #tpu.dot_dimension_numbers<[0], [0], [1], [1], [0, 1, 1, 1], [], []>} : vector<8x32xf32>, vector<8x64xf32>, vector<32x64xf32> -> vector<32x64xf32>
    %114 = arith.addf %96, %113 : vector<32x64xf32>
    %115 = vector.extract_strided_slice %22 {offsets = [8, 64], sizes = [8, 64], strides = [1, 1]} : vector<96x128xf32> to vector<8x64xf32>
    %116 = vector.extract_strided_slice %22 {offsets = [40, 64], sizes = [8, 64], strides = [1, 1]} : vector<96x128xf32> to vector<8x64xf32>
    %117 = vector.extract_strided_slice %22 {offsets = [72, 64], sizes = [8, 64], strides = [1, 1]} : vector<96x128xf32> to vector<8x64xf32>
    %cst_38 = arith.constant dense<0.000000e+00> : vector<64x64xf32>
    %118 = tpu.matmul %116, %115, %cst_38 {dimension_numbers = #tpu.dot_dimension_numbers<[0], [0], [1], [1], [0, 1, 1, 1], [], []>} : vector<8x64xf32>, vector<8x64xf32>, vector<64x64xf32> -> vector<64x64xf32>
    %cst_39 = arith.constant dense<0xFF800000> : vector<64xf32>
    %119 = vector.multi_reduction <maximumf>, %118, %cst_39 [0] : vector<64x64xf32> to vector<64xf32>
    %120 = vector.shape_cast %119 : vector<64xf32> to vector<1x64xf32>
    %121 = vector.broadcast %120 : vector<1x64xf32> to vector<64x64xf32>
    %122 = arith.subf %118, %121 : vector<64x64xf32>
    %123 = math.exp %122 : vector<64x64xf32>
    %cst_40 = arith.constant dense<0.000000e+00> : vector<64xf32>
    %124 = vector.multi_reduction <add>, %123, %cst_40 [0] : vector<64x64xf32> to vector<64xf32>
    %125 = vector.shape_cast %124 : vector<64xf32> to vector<1x64xf32>
    %cst_41 = arith.constant dense<0.000000e+00> : vector<8x64xf32>
    %126 = tpu.matmul %117, %123, %cst_41 {dimension_numbers = #tpu.dot_dimension_numbers<[1], [0], [0], [1], [0, 0, 1, 1], [], []>} : vector<8x64xf32>, vector<64x64xf32>, vector<8x64xf32> -> vector<8x64xf32>
    %127 = tpu.reciprocal %125 : vector<1x64xf32> -> vector<1x64xf32>
    %128 = vector.broadcast %127 : vector<1x64xf32> to vector<8x64xf32>
    %129 = arith.mulf %126, %128 : vector<8x64xf32>
    %130 = vector.extract_strided_slice %19 {offsets = [8, 0], sizes = [8, 32], strides = [1, 1]} : vector<32x32xf32> to vector<8x32xf32>
    %cst_42 = arith.constant dense<0.000000e+00> : vector<32x64xf32>
    %131 = tpu.matmul %130, %129, %cst_42 {dimension_numbers = #tpu.dot_dimension_numbers<[0], [0], [1], [1], [0, 1, 1, 1], [], []>} : vector<8x32xf32>, vector<8x64xf32>, vector<32x64xf32> -> vector<32x64xf32>
    %132 = arith.addf %114, %131 : vector<32x64xf32>
    %133 = vector.extract_strided_slice %22 {offsets = [16, 64], sizes = [8, 64], strides = [1, 1]} : vector<96x128xf32> to vector<8x64xf32>
    %134 = vector.extract_strided_slice %22 {offsets = [48, 64], sizes = [8, 64], strides = [1, 1]} : vector<96x128xf32> to vector<8x64xf32>
    %135 = vector.extract_strided_slice %22 {offsets = [80, 64], sizes = [8, 64], strides = [1, 1]} : vector<96x128xf32> to vector<8x64xf32>
    %cst_43 = arith.constant dense<0.000000e+00> : vector<64x64xf32>
    %136 = tpu.matmul %134, %133, %cst_43 {dimension_numbers = #tpu.dot_dimension_numbers<[0], [0], [1], [1], [0, 1, 1, 1], [], []>} : vector<8x64xf32>, vector<8x64xf32>, vector<64x64xf32> -> vector<64x64xf32>
    %cst_44 = arith.constant dense<0xFF800000> : vector<64xf32>
    %137 = vector.multi_reduction <maximumf>, %136, %cst_44 [0] : vector<64x64xf32> to vector<64xf32>
    %138 = vector.shape_cast %137 : vector<64xf32> to vector<1x64xf32>
    %139 = vector.broadcast %138 : vector<1x64xf32> to vector<64x64xf32>
    %140 = arith.subf %136, %139 : vector<64x64xf32>
    %141 = math.exp %140 : vector<64x64xf32>
    %cst_45 = arith.constant dense<0.000000e+00> : vector<64xf32>
    %142 = vector.multi_reduction <add>, %141, %cst_45 [0] : vector<64x64xf32> to vector<64xf32>
    %143 = vector.shape_cast %142 : vector<64xf32> to vector<1x64xf32>
    %cst_46 = arith.constant dense<0.000000e+00> : vector<8x64xf32>
    %144 = tpu.matmul %135, %141, %cst_46 {dimension_numbers = #tpu.dot_dimension_numbers<[1], [0], [0], [1], [0, 0, 1, 1], [], []>} : vector<8x64xf32>, vector<64x64xf32>, vector<8x64xf32> -> vector<8x64xf32>
    %145 = tpu.reciprocal %143 : vector<1x64xf32> -> vector<1x64xf32>
    %146 = vector.broadcast %145 : vector<1x64xf32> to vector<8x64xf32>
    %147 = arith.mulf %144, %146 : vector<8x64xf32>
    %148 = vector.extract_strided_slice %19 {offsets = [16, 0], sizes = [8, 32], strides = [1, 1]} : vector<32x32xf32> to vector<8x32xf32>
    %cst_47 = arith.constant dense<0.000000e+00> : vector<32x64xf32>
    %149 = tpu.matmul %148, %147, %cst_47 {dimension_numbers = #tpu.dot_dimension_numbers<[0], [0], [1], [1], [0, 1, 1, 1], [], []>} : vector<8x32xf32>, vector<8x64xf32>, vector<32x64xf32> -> vector<32x64xf32>
    %150 = arith.addf %132, %149 : vector<32x64xf32>
    %151 = vector.extract_strided_slice %22 {offsets = [24, 64], sizes = [8, 64], strides = [1, 1]} : vector<96x128xf32> to vector<8x64xf32>
    %152 = vector.extract_strided_slice %22 {offsets = [56, 64], sizes = [8, 64], strides = [1, 1]} : vector<96x128xf32> to vector<8x64xf32>
    %153 = vector.extract_strided_slice %22 {offsets = [88, 64], sizes = [8, 64], strides = [1, 1]} : vector<96x128xf32> to vector<8x64xf32>
    %cst_48 = arith.constant dense<0.000000e+00> : vector<64x64xf32>
    %154 = tpu.matmul %152, %151, %cst_48 {dimension_numbers = #tpu.dot_dimension_numbers<[0], [0], [1], [1], [0, 1, 1, 1], [], []>} : vector<8x64xf32>, vector<8x64xf32>, vector<64x64xf32> -> vector<64x64xf32>
    %cst_49 = arith.constant dense<0xFF800000> : vector<64xf32>
    %155 = vector.multi_reduction <maximumf>, %154, %cst_49 [0] : vector<64x64xf32> to vector<64xf32>
    %156 = vector.shape_cast %155 : vector<64xf32> to vector<1x64xf32>
    %157 = vector.broadcast %156 : vector<1x64xf32> to vector<64x64xf32>
    %158 = arith.subf %154, %157 : vector<64x64xf32>
    %159 = math.exp %158 : vector<64x64xf32>
    %cst_50 = arith.constant dense<0.000000e+00> : vector<64xf32>
    %160 = vector.multi_reduction <add>, %159, %cst_50 [0] : vector<64x64xf32> to vector<64xf32>
    %161 = vector.shape_cast %160 : vector<64xf32> to vector<1x64xf32>
    %cst_51 = arith.constant dense<0.000000e+00> : vector<8x64xf32>
    %162 = tpu.matmul %153, %159, %cst_51 {dimension_numbers = #tpu.dot_dimension_numbers<[1], [0], [0], [1], [0, 0, 1, 1], [], []>} : vector<8x64xf32>, vector<64x64xf32>, vector<8x64xf32> -> vector<8x64xf32>
    %163 = tpu.reciprocal %161 : vector<1x64xf32> -> vector<1x64xf32>
    %164 = vector.broadcast %163 : vector<1x64xf32> to vector<8x64xf32>
    %165 = arith.mulf %162, %164 : vector<8x64xf32>
    %166 = vector.extract_strided_slice %19 {offsets = [24, 0], sizes = [8, 32], strides = [1, 1]} : vector<32x32xf32> to vector<8x32xf32>
    %cst_52 = arith.constant dense<0.000000e+00> : vector<32x64xf32>
    %167 = tpu.matmul %166, %165, %cst_52 {dimension_numbers = #tpu.dot_dimension_numbers<[0], [0], [1], [1], [0, 1, 1, 1], [], []>} : vector<8x32xf32>, vector<8x64xf32>, vector<32x64xf32> -> vector<32x64xf32>
    %168 = arith.addf %150, %167 : vector<32x64xf32>
    %169 = tpu.concatenate %95, %168 in 1 : vector<32x64xf32>, vector<32x64xf32> -> vector<32x128xf32>
    %170 = arith.addf %169, %17 : vector<32x128xf32>
    %cst_53 = arith.constant dense<0.000000e+00> : vector<128xf32>
    %171 = vector.multi_reduction <add>, %170, %cst_53 [0] : vector<32x128xf32> to vector<128xf32>
    %172 = vector.shape_cast %171 : vector<128xf32> to vector<1x128xf32>
    %cst_54 = arith.constant 3.200000e+01 : f32
    %173 = vector.broadcast %cst_54 : f32 to vector<1x128xf32>
    %174 = arith.divf %172, %173 : vector<1x128xf32>
    %175 = vector.broadcast %174 : vector<1x128xf32> to vector<32x128xf32>
    %176 = arith.subf %170, %175 : vector<32x128xf32>
    %177 = arith.mulf %176, %176 : vector<32x128xf32>
    %cst_55 = arith.constant dense<0.000000e+00> : vector<128xf32>
    %178 = vector.multi_reduction <add>, %177, %cst_55 [0] : vector<32x128xf32> to vector<128xf32>
    %179 = vector.shape_cast %178 : vector<128xf32> to vector<1x128xf32>
    %cst_56 = arith.constant 3.200000e+01 : f32
    %180 = vector.broadcast %cst_56 : f32 to vector<1x128xf32>
    %181 = arith.divf %179, %180 : vector<1x128xf32>
    %182 = vector.broadcast %174 : vector<1x128xf32> to vector<32x128xf32>
    %183 = arith.subf %170, %182 : vector<32x128xf32>
    %cst_57 = arith.constant 9.99999997E-7 : f32
    %184 = vector.broadcast %cst_57 : f32 to vector<1x128xf32>
    %185 = arith.addf %181, %184 : vector<1x128xf32>
    %186 = math.rsqrt %185 : vector<1x128xf32>
    %187 = vector.broadcast %186 : vector<1x128xf32> to vector<32x128xf32>
    %188 = arith.mulf %183, %187 : vector<32x128xf32>
    %189 = vector.broadcast %4 : vector<32x1xf32> to vector<32x128xf32>
    %190 = arith.mulf %188, %189 : vector<32x128xf32>
    %191 = vector.broadcast %5 : vector<32x1xf32> to vector<32x128xf32>
    %192 = arith.addf %190, %191 : vector<32x128xf32>
    %cst_58 = arith.constant dense<0.000000e+00> : vector<32x128xf32>
    %193 = tpu.matmul %20, %192, %cst_58 {dimension_numbers = #tpu.dot_dimension_numbers<[1], [0], [0], [1], [0, 0, 1, 1], [], []>} : vector<32x32xf32>, vector<32x128xf32>, vector<32x128xf32> -> vector<32x128xf32>
    %194 = vector.broadcast %6 : vector<32x1xf32> to vector<32x128xf32>
    %195 = arith.addf %193, %194 : vector<32x128xf32>
    %cst_59 = arith.constant 0.000000e+00 : f32
    %196 = vector.broadcast %cst_59 : f32 to vector<32x128xf32>
    %197 = arith.maximumf %195, %196 : vector<32x128xf32>
    %cst_60 = arith.constant dense<0.000000e+00> : vector<32x128xf32>
    %198 = tpu.matmul %21, %197, %cst_60 {dimension_numbers = #tpu.dot_dimension_numbers<[1], [0], [0], [1], [0, 0, 1, 1], [], []>} : vector<32x32xf32>, vector<32x128xf32>, vector<32x128xf32> -> vector<32x128xf32>
    %199 = vector.broadcast %7 : vector<32x1xf32> to vector<32x128xf32>
    %200 = arith.addf %198, %199 : vector<32x128xf32>
    %201 = arith.addf %200, %192 : vector<32x128xf32>
    %cst_61 = arith.constant dense<0.000000e+00> : vector<128xf32>
    %202 = vector.multi_reduction <add>, %201, %cst_61 [0] : vector<32x128xf32> to vector<128xf32>
    %203 = vector.shape_cast %202 : vector<128xf32> to vector<1x128xf32>
    %cst_62 = arith.constant 3.200000e+01 : f32
    %204 = vector.broadcast %cst_62 : f32 to vector<1x128xf32>
    %205 = arith.divf %203, %204 : vector<1x128xf32>
    %206 = vector.broadcast %205 : vector<1x128xf32> to vector<32x128xf32>
    %207 = arith.subf %201, %206 : vector<32x128xf32>
    %208 = arith.mulf %207, %207 : vector<32x128xf32>
    %cst_63 = arith.constant dense<0.000000e+00> : vector<128xf32>
    %209 = vector.multi_reduction <add>, %208, %cst_63 [0] : vector<32x128xf32> to vector<128xf32>
    %210 = vector.shape_cast %209 : vector<128xf32> to vector<1x128xf32>
    %cst_64 = arith.constant 3.200000e+01 : f32
    %211 = vector.broadcast %cst_64 : f32 to vector<1x128xf32>
    %212 = arith.divf %210, %211 : vector<1x128xf32>
    %213 = vector.broadcast %205 : vector<1x128xf32> to vector<32x128xf32>
    %214 = arith.subf %201, %213 : vector<32x128xf32>
    %cst_65 = arith.constant 9.99999997E-7 : f32
    %215 = vector.broadcast %cst_65 : f32 to vector<1x128xf32>
    %216 = arith.addf %212, %215 : vector<1x128xf32>
    %217 = math.rsqrt %216 : vector<1x128xf32>
    %218 = vector.broadcast %217 : vector<1x128xf32> to vector<32x128xf32>
    %219 = arith.mulf %214, %218 : vector<32x128xf32>
    %220 = vector.broadcast %8 : vector<32x1xf32> to vector<32x128xf32>
    %221 = arith.mulf %219, %220 : vector<32x128xf32>
    %222 = vector.broadcast %9 : vector<32x1xf32> to vector<32x128xf32>
    %223 = arith.addf %221, %222 : vector<32x128xf32>
    %c0_66 = arith.constant 0 : index
    %c0_67 = arith.constant 0 : index
    %224 = vector.load %arg6[%c0_66, %c0_67] : memref<32x128xf32, #tpu.memory_space<vmem>>, vector<32x128xf32>
    tpu.vector_store %arg6[%c0_66, %c0_67], %223 {strides = array<i32>} : memref<32x128xf32, #tpu.memory_space<vmem>>, vector<32x128xf32>,
    return
  }
  func.func @transform_0(%arg0: i32) -> (i32, i32) {
    %c0_i32 = arith.constant 0 : i32
    %c0_i32_0 = arith.constant 0 : i32
    %c0_i32_1 = arith.constant 0 : i32
    return %c0_i32, %c0_i32_0 : i32, i32
  }
  func.func @transform_1(%arg0: i32) -> (i32, i32) {
    %c0_i32 = arith.constant 0 : i32
    %c0_i32_0 = arith.constant 0 : i32
    %c0_i32_1 = arith.constant 0 : i32
    return %c0_i32, %c0_i32_0 : i32, i32
  }
  func.func @transform_2(%arg0: i32) -> (i32, i32) {
    %c0_i32 = arith.constant 0 : i32
    %c0_i32_0 = arith.constant 0 : i32
    %c0_i32_1 = arith.constant 0 : i32
    return %c0_i32, %c0_i32_0 : i32, i32
  }
  func.func @transform_3(%arg0: i32) -> (i32, i32) {
    %c0_i32 = arith.constant 0 : i32
    %c0_i32_0 = arith.constant 0 : i32
    %c0_i32_1 = arith.constant 0 : i32
    return %c0_i32, %c0_i32_0 : i32, i32
  }
  func.func @transform_4(%arg0: i32) -> (i32, i32) {
    %c0_i32 = arith.constant 0 : i32
    %c0_i32_0 = arith.constant 0 : i32
    %c0_i32_1 = arith.constant 0 : i32
    return %c0_i32, %c0_i32_0 : i32, i32
  }
  func.func @transform_5(%arg0: i32) -> (i32, i32) {
    %c0_i32 = arith.constant 0 : i32
    %c0_i32_0 = arith.constant 0 : i32
    %c0_i32_1 = arith.constant 0 : i32
    return %c0_i32, %c0_i32_0 : i32, i32
  }
}

</mosaic_0001>

<bundles_post_ra>
// kernel: tpu_custom_call.1
= control target key start
LH: loop header
LB: loop body
LE: loop exit
PB: predicated region body
PF: predicated region fallthrough
CT: control target
= control target key end

     0   :  { %vm75_vm0 = vcmask 130048   ;;  %v5045_v4 = vmov 0   ;;  %s5985_s0 = inlined_call_operand.vmem [shape: f32[16,128], index: 0, kind: input, shape index: {}]   ;;  %s5986_s1 = inlined_call_operand.vmem [shape: f32[32,128], index: 1, kind: input, shape index: {}]   ;;  %s5987_s2 = inlined_call_operand.vmem [shape: f32[32,16], index: 2, kind: input, shape index: {}]   ;;  %s5988_s3 = inlined_call_operand.vmem [shape: f32[192,32], index: 3, kind: input, shape index: {}]   ;;  %s5989_s4 = inlined_call_operand.vmem [shape: f32[32,8], index: 4, kind: input, shape index: {}]   ;;  %s5990_s5 = inlined_call_operand.hbm [shape: f32[32,128], index: 5, kind: output, shape index: {}]  }
   0x1   :  { %v22_v0 = vld [vmem:[%s5985_s0 + $0x8] sm:$0xff]  ;;  %v21_v1 = vld [vmem:[%s5985_s0] sm:$0xff]  ;;  %4856 = vset.pattern.permute.xlu1 %v5045_v4  ;;  %v50_v5 = vld [vmem:[%s5989_s4 + $0x18] sm:$0xff]  ;;  %4855 = vset.pattern.permute.xlu0 %v5045_v4 }
   0x2   :  { %v51_v2 = vld [vmem:[%s5987_s2] sm:$0xff]  ;;  %4450 = vmatprep.subr.mxu0 %v22_v0  ;;  %v52_v3 = vld [vmem:[%s5987_s2 + $0x8] sm:$0xff]  ;;  %v53_v7 = vld [vmem:[%s5987_s2 + $0x10] sm:$0xff] }
   0x3   :  { %4454 = vmatprep.mubr.msk.f32.mxu0 %vm75_vm0, %v51_v2  ;;  %4451 = vmatpush3.msra.mxu0 %v22_v0  ;;  %v48_v6 = vld [vmem:[%s5989_s4 + $0x8] sm:$0xff] }
   0x4   :  { %4452 = vmatprep.subr.mxu0 %v21_v1 }
   0x5   :  { %10 = vsyncpa [#allocation3], 0  ;;  %4453 = vmatpush3.msra.mxu0 %v21_v1  ;;  %72 = vperm.xlu0 %4855, %v50_v5   ;;  %v49_v8 = vld [vmem:[%s5989_s4 + $0x10] sm:$0xff]  ;;  %v54_v9 = vld [vmem:[%s5987_s2 + $0x18] sm:$0xff]  ;;  %vm185_vm1 = vcmask 261120   ;;  %s5046_s15 = smov 64  }
   0x6   :  { %4455 = vmatmul.mubr.msk.f32.vlgmr.msra.gmra.mxu0 %vm75_vm0, %v52_v3  ;;  %62 = vperm.xlu1 %4856, %v48_v6   ;;  %v47_v10 = vld [vmem:[%s5989_s4] sm:$0xff]  ;;  %v180_v21 = vld [vmem:[%s5986_s1 + $0x18] sm:$0xff]  ;;  %v179_v26 = vld [vmem:[%s5986_s1 + $0x10] sm:$0xff]  ;;  %vm379_vm2 = vcmask 64512   ;;  %vm5048_vm3 = vmmov 0   ;;  %vm509_vm4 = vcmask 523264  }
   0x7   :  { %4457 = vmatprep.mubr.msk.f32.mxu0 %vm75_vm0, %v53_v7  ;;  %v23_v11 = vld [vmem:[%s5988_s3] sm:$0xff]  ;;  %v178_v30 = vld [vmem:[%s5986_s1 + $0x8] sm:$0xff]  ;;  %v25_v37 = vld [vmem:[%s5988_s3 + $0x10] sm:$0xff] }
   0x8   :  { %4468 = vmatprep.mubr.msk.f32.mxu1 %vm185_vm1, %v23_v11  ;;  %v177_v33 = vld [vmem:[%s5986_s1] sm:$0xff]  ;;  %v24_v36 = vld [vmem:[%s5988_s3 + $0x8] sm:$0xff]  ;;  %v26_v38 = vld [vmem:[%s5988_s3 + $0x18] sm:$0xff] }
   0x9   :  { %67 = vperm.xlu0 %4855, %v49_v8   ;;  %v27_v39 = vld [vmem:[%s5988_s3 + $0x20] sm:$0xff]  ;;  %v28_v40 = vld [vmem:[%s5988_s3 + $0x28] sm:$0xff]  ;;  %v29_v41 = vld [vmem:[%s5988_s3 + $0x30] sm:$0xff] }
   0xa   :  { %4458 = vmatmul.mubr.msk.f32.gmra.mxu0 %vm75_vm0, %v54_v9  ;;  %57 = vperm.xlu1 %4856, %v47_v10   ;;  %v30_v42 = vld [vmem:[%s5988_s3 + $0x38] sm:$0xff]  ;;  %v31_v43 = vld [vmem:[%s5988_s3 + $0x40] sm:$0xff]  ;;  %v32_v44 = vld [vmem:[%s5988_s3 + $0x48] sm:$0xff] }
   0xb   :  { %v36_v52 = vld [vmem:[%s5988_s3 + $0x68] sm:$0xff]  ;;  %v35_v54 = vld [vmem:[%s5988_s3 + $0x60] sm:$0xff]  ;;  %v37_v63 = vld [vmem:[%s5988_s3 + $0x70] sm:$0xff] }
  0x80   :  { %v73_v13 = vpop.permute.xlu0 %72 }
  0x81   :  { %v63_v12 = vpop.permute.xlu1 %62 }
  0x84   :  { %v68_v20 = vpop.permute.xlu0 %67 }
  0x85   :  { %v58_v16 = vpop.permute.xlu1 %57 }
  0xc6   :  { %v4456_v14 = vpop.f32.mrf.mxu0 }
  0xc7   :  { %v160_v18 = vadd.f32 %v4456_v14, %v63_v12 }
  0xc8   :  { %v154_v15 = vpop.f32.mrf.mxu0 }
  0xc9   :  { %v155_v23 = vadd.f32 %v154_v15, %v58_v16  ;;  %v174_v27 = vmax.f32 %v160_v18, 0.0 }
  0xca   :  { %v4459_v17 = vpop.f32.mrf.mxu0 }
  0xcb   :  { %v170_v19 = vadd.f32 %v4459_v17, %v73_v13  ;;  %v173_v31 = vmax.f32 %v155_v23, 0.0  ;;  %v5144_v34 = vadd.f32 %v178_v30, %v174_v27 }
  0xcc   :  { %v164_v22 = vpop.f32.mrf.mxu0 }
  0xcd   :  { %v176_v24 = vmax.f32 %v170_v19, 0.0  ;;  %v165_v25 = vadd.f32 %v164_v22, %v68_v20  ;;  %6009 = vst [vmem:[#allocation7_spill] sm:$0xff] %v5144_v34  ;;  %v5148_v35 = vadd.f32 %v177_v33, %v173_v31 }
  0xcf   :  { %v5132_v28 = vadd.f32 %v180_v21, %v176_v24  ;;  %v175_v29 = vmax.f32 %v165_v25, 0.0  ;;  %6010 = vst [vmem:[#allocation8_spill] sm:$0xff] %v5148_v35 }
  0xd1   :  { %6007 = vst [vmem:[#allocation5_spill] sm:$0xff] %v5132_v28  ;;  %v5137_v32 = vadd.f32 %v179_v26, %v175_v29  ;;  %4460 = vmatprep.subr.mxu1 %v5132_v28 }
  0xd2   :  { %4461 = vmatpush3.msra.mxu1 %v5132_v28 }
  0xd3   :  { %6008 = vst [vmem:[#allocation6_spill] sm:$0xff] %v5137_v32  ;;  %4462 = vmatprep.subr.mxu1 %v5137_v32 }
  0xd4   :  { %4463 = vmatpush3.msra.mxu1 %v5137_v32 }
  0xd5   :  { %4464 = vmatprep.subr.mxu1 %v5144_v34 }
  0xd6   :  { %4465 = vmatpush3.msra.mxu1 %v5144_v34 }
  0xd7   :  { %4466 = vmatprep.subr.mxu1 %v5148_v35 }
  0xd8   :  { %4467 = vmatpush3.msra.mxu1 %v5148_v35 }
  0xd9   :  { %4469 = vmatmul.mubr.msk.f32.vlgmr.msra.gmra.mxu1 %vm185_vm1, %v24_v36 }
  0xda   :  { %4471 = vmatprep.mubr.msk.f32.mxu1 %vm185_vm1, %v25_v37 }
  0xdd   :  { %4472 = vmatmul.mubr.msk.f32.gmra.mxu1 %vm185_vm1, %v26_v38 }
  0xde   :  { %4474 = vmatprep.mubr.msk.f32.mxu1 %vm185_vm1, %v27_v39 }
  0xe1   :  { %4475 = vmatmul.mubr.msk.f32.gmra.mxu1 %vm185_vm1, %v28_v40  ;;  %v5991_v40 = vmov 0.0  }
  0xe2   :  { %4477 = vmatprep.mubr.msk.f32.mxu1 %vm185_vm1, %v29_v41  ;;  %4533 = vmatprep.subr.mxu1 %v5991_v40  ;;  %v38_v41 = vld [vmem:[%s5988_s3 + $0x78] sm:$0xff] }
  0xe5   :  { %4478 = vmatmul.mubr.msk.f32.gmra.mxu1 %vm185_vm1, %v30_v42 }
  0xe6   :  { %4480 = vmatprep.mubr.msk.f32.mxu1 %vm185_vm1, %v31_v43 }
  0xe9   :  { %4481 = vmatmul.mubr.msk.f32.gmra.mxu1 %vm185_vm1, %v32_v44 }
 0x199   :  { %v5190_v45 = vpop.f32.mrf.mxu1 }
 0x19b   :  { %v288_v46 = vpop.f32.mrf.mxu1 }
 0x19c   :  { %4486 = vmatprep.subr.mxu0 %v288_v46 }
 0x19d   :  { %v5192_v47 = vpop.f32.mrf.mxu1  ;;  %4487 = vmatpush3.msra.mxu0 %v288_v46 }
 0x19e   :  { %4500 = vmatprep.subr.mxu0 %v5991_v40 }
 0x19f   :  { %v5194_v48 = vpop.f32.mrf.mxu1 }
 0x1a1   :  { %v4476_v49 = vpop.f32.mrf.mxu1 }
 0x1a2   :  { %651 = vxpose.xlu1.b32.start.end [1/1] (short) (narrow) %v4476_v49, 64 }
 0x1a3   :  { %v308_v50 = vpop.f32.mrf.mxu1 }
 0x1a4   :  { %347 = vxpose.xlu0.b32.start.end [1/1] (short) (narrow) %v308_v50, 64 }
 0x1a5   :  { %v5196_v51 = vpop.f32.mrf.mxu1 }
 0x1a7   :  { %v318_v53 = vpop.f32.mrf.mxu1 }
 0x1a9   :  { %v5249_v14 = vpop.f32.mrf.mxu1 }
 0x1ab   :  { %v5255_v17 = vpop.f32.mrf.mxu1 }
 0x1bf   :  { %953 = vxpose.xlu1.b32.start.end [1/1] (short) (narrow) %v36_v52, 32 }
 0x1c1   :  { %1211 = vxpose.xlu0.b32.start.end [1/1] (short) (narrow) %v318_v53, 64 }
 0x1cc   :  { %1646 = vxpose.xlu1.b32.start.end [1/1] (short) (narrow) %v5196_v51, 64 }
 0x1de   :  { %1082 = vxpose.xlu0.b32.start.end [1/1] (short) (narrow) %v35_v54, 32 }
 0x206   :  { %2082 = vrot.lane.b32.xlu1 %v308_v50, %s5046_s15 }
 0x213   :  { %2393 = vrot.lane.b32.xlu0 %v4476_v49, %s5046_s15 }
 0x217   :  { %2118 = vrot.lane.b32.xlu0 %v288_v46, %s5046_s15 }
 0x21b   :  { %2429 = vrot.lane.b32.xlu0 %v5190_v45, %s5046_s15 }
 0x21e   :  { %v5210_v55 = vpop.trf.xlu1 }
 0x220   :  { %v363_v56 = vpop.trf.xlu0 }
 0x221   :  { %4488 = vmatprep.mubr.msk.f32.mxu0 %vm379_vm2, %v363_v56 }
 0x222   :  { %v5213_v57 = vpop.trf.xlu1 }
 0x224   :  { %v364_v58 = vpop.trf.xlu0 }
 0x225   :  { %4489 = vmatmul.mubr.msk.f32.vlgmr.msra.gmra.mxu0 %vm379_vm2, %v364_v58 }
 0x226   :  { %v5216_v59 = vpop.trf.xlu1 }
 0x228   :  { %v365_v60 = vpop.trf.xlu0 }
 0x229   :  { %4491 = vmatprep.mubr.msk.f32.mxu0 %vm379_vm2, %v365_v60 }
 0x22a   :  { %v5219_v61 = vpop.trf.xlu1 }
 0x22c   :  { %v366_v62 = vpop.trf.xlu0 }
 0x22d   :  { %4492 = vmatmul.mubr.msk.f32.gmra.mxu0 %vm379_vm2, %v366_v62 }
 0x22e   :  { %v5225_v0 = vpop.trf.xlu1 }
 0x22f   :  { %1513 = vxpose.xlu1.b32.start.end [1/1] (short) (narrow) %v37_v63, 32 }
 0x230   :  { %v367_v1 = vpop.trf.xlu0 }
 0x231   :  { %4494 = vmatprep.mubr.msk.f32.mxu0 %vm379_vm2, %v367_v1 }
 0x232   :  { %v5228_v2 = vpop.trf.xlu1 }
 0x234   :  { %v368_v3 = vpop.trf.xlu0 }
 0x235   :  { %4495 = vmatmul.mubr.msk.f32.gmra.mxu0 %vm379_vm2, %v368_v3 }
 0x236   :  { %v5231_v4 = vpop.trf.xlu1 }
 0x238   :  { %v369_v5 = vpop.trf.xlu0 }
 0x239   :  { %4497 = vmatprep.mubr.msk.f32.mxu0 %vm379_vm2, %v369_v5 }
 0x23a   :  { %v5234_v6 = vpop.trf.xlu1 }
 0x23c   :  { %v370_v7 = vpop.trf.xlu0 }
 0x23d   :  { %4498 = vmatmul.mubr.msk.f32.gmra.mxu0 %vm379_vm2, %v370_v7 }
 0x23e   :  { %v5237_v8 = vpop.trf.xlu1  ;;  %4516 = vmatprep.mubr.msk.f32.mxu0 %vm5048_vm3, %v5991_v40 }
 0x23f   :  { %6011 = vst [vmem:[#allocation9_spill] sm:$0xff] %v5237_v8 }
 0x240   :  { %v5245_v12 = vpop.trf.xlu0 }
 0x242   :  { %v5239_v9 = vpop.trf.xlu1 }
 0x244   :  { %v5253_v16 = vpop.trf.xlu0 }
 0x246   :  { %v5241_v10 = vpop.trf.xlu1 }
 0x248   :  { %v5261_v19 = vpop.trf.xlu0 }
 0x24a   :  { %v5243_v11 = vpop.trf.xlu1 }
 0x24c   :  { %v5267_v21 = vpop.trf.xlu0 }
 0x24e   :  { %v5247_v13 = vpop.trf.xlu1 }
 0x250   :  { %v5272_v23 = vpop.trf.xlu0 }
 0x252   :  { %v5251_v15 = vpop.trf.xlu1 }
 0x254   :  { %v5278_v25 = vpop.trf.xlu0 }
 0x256   :  { %v5257_v18 = vpop.trf.xlu1 }
 0x258   :  { %v5282_v27 = vpop.trf.xlu0 }
 0x259   :  { %2316 = vrot.lane.b32.xlu1 %v5255_v17, %s5046_s15 }
 0x25a   :  { %v5263_v20 = vpop.trf.xlu1 }
 0x25c   :  { %v5286_v30 = vpop.trf.xlu0 }
 0x25d   :  { %2627 = vrot.lane.b32.xlu1 %v5249_v14, %s5046_s15 }
 0x25e   :  { %v5269_v22 = vpop.trf.xlu1 }
 0x260   :  { %v5288_v33 = vpop.trf.xlu0 }
 0x261   :  { %2874 = vrot.lane.b32.xlu1 %v318_v53, %s5046_s15 }
 0x262   :  { %v5276_v24 = vpop.trf.xlu1 }
 0x263   :  { %6012 = vst [vmem:[#allocation10_spill] sm:$0xff] %v5276_v24 }
 0x264   :  { %v5290_v36 = vpop.trf.xlu0 }
 0x265   :  { %2910 = vrot.lane.b32.xlu1 %v5194_v48, %s5046_s15 }
 0x266   :  { %v5280_v26 = vpop.trf.xlu1 }
 0x267   :  { %6013 = vst [vmem:[#allocation11_spill] sm:$0xff] %v5280_v26 }
 0x268   :  { %v5292_v37 = vpop.trf.xlu0 }
 0x26a   :  { %v5284_v29 = vpop.trf.xlu1 }
 0x26b   :  { %6014 = vst [vmem:[#allocation12_spill] sm:$0xff] %v5284_v29 }
 0x26c   :  { %v5294_v38 = vpop.trf.xlu0 }
 0x278   :  { %v2083_v31 = vpop.permute.xlu1 %2082 }
 0x279   :  { %2085 = vxpose.xlu0.b32.start.end [1/1] (short) (narrow) %v2083_v31, 64 }
 0x285   :  { %v2394_v39 = vpop.permute.xlu0 %2393 }
 0x289   :  { %v5317_v54 = vpop.permute.xlu0 %2118 }
 0x28a   :  { %6021 = vst [vmem:[#allocation19_spill] sm:$0xff] %v5317_v54 }
 0x28d   :  { %v5319_v60 = vpop.permute.xlu0 %2429 }
 0x28e   :  { %6022 = vst [vmem:[#allocation20_spill] sm:$0xff] %v5319_v60 }
 0x296   :  { %2396 = vxpose.xlu0.b32.start.end [1/1] (short) (narrow) %v2394_v39, 64 }
 0x2ab   :  { %v5301_v42 = vpop.trf.xlu1 }
 0x2ac   :  { %6015 = vst [vmem:[#allocation13_spill] sm:$0xff] %v5301_v42 }
 0x2af   :  { %v5303_v43 = vpop.trf.xlu1 }
 0x2b0   :  { %6016 = vst [vmem:[#allocation14_spill] sm:$0xff] %v5303_v43 }
 0x2b3   :  { %1948 = vxpose.xlu0.b32.start.end [1/1] (short) (narrow) %v38_v41, 32  ;;  %v5307_v44 = vpop.trf.xlu1 }
 0x2b4   :  { %6017 = vst [vmem:[#allocation15_spill] sm:$0xff] %v5307_v44 }
 0x2b7   :  { %v5309_v46 = vpop.trf.xlu1 }
 0x2b8   :  { %6018 = vst [vmem:[#allocation16_spill] sm:$0xff] %v5309_v46 }
 0x2cb   :  { %v5311_v49 = vpop.permute.xlu1 %2316 }
 0x2cc   :  { %6019 = vst [vmem:[#allocation17_spill] sm:$0xff] %v5311_v49 }
 0x2cf   :  { %v5313_v50 = vpop.permute.xlu1 %2627 }
 0x2d0   :  { %6020 = vst [vmem:[#allocation18_spill] sm:$0xff] %v5313_v50 }
 0x2d3   :  { %v2875_v52 = vpop.permute.xlu1 %2874 }
 0x2d4   :  { %2877 = vxpose.xlu1.b32.start.end [1/1] (short) (narrow) %v2875_v52, 64 }
 0x2e5   :  { %v4490_v53 = vpop.f32.mrf.mxu0 }
 0x2e6   :  { %v511_v32 = vsel %vm509_vm4, %v4490_v53, -inf }
 0x2e7   :  { %v470_v56 = vpop.f32.mrf.mxu0 }
 0x2e8   :  { %3274 = vrot.lane.b32.xlu0 %v5196_v51, %s5046_s15  ;;  %v510_v51 = vsel %vm509_vm4, %v470_v56, -inf }
 0x2ed   :  { %v4493_v58 = vpop.f32.mrf.mxu0 }
 0x2ee   :  { %v513_v35 = vsel %vm509_vm4, %v4493_v58, -inf }
 0x2ef   :  { %v480_v62 = vpop.f32.mrf.mxu0 }
 0x2f0   :  { %v512_v34 = vsel %vm509_vm4, %v480_v62, -inf }
 0x2f5   :  { %v4496_v63 = vpop.f32.mrf.mxu0  ;;  %v5321_v1 = vpop.trf.xlu0 }
 0x2f6   :  { %6023 = vst [vmem:[#allocation21_spill] sm:$0xff] %v5321_v1  ;;  %v516_v41 = vsel %vm509_vm4, %v4496_v63, -inf }
 0x2f7   :  { %v490_v3 = vpop.f32.mrf.mxu0  ;;  %v517_v49 = vmax.f32 %v511_v32, %v516_v41 }
 0x2f8   :  { %v514_v7 = vsel %vm509_vm4, %v490_v3, -inf }
 0x2f9   :  { %v5323_v5 = vpop.trf.xlu0  ;;  %v515_v40 = vmax.f32 %v510_v51, %v514_v7 }
 0x2fa   :  { %6024 = vst [vmem:[#allocation22_spill] sm:$0xff] %v5323_v5 }
 0x2fb   :  { %v522_v1 = vmax.f32 %v515_v40, %v517_v49 }
 0x2fd   :  { %v4499_v31 = vpop.f32.mrf.mxu0  ;;  %v5326_v39 = vpop.trf.xlu0 }
 0x2fe   :  { %6025 = vst [vmem:[#allocation23_spill] sm:$0xff] %v5326_v39  ;;  %v520_v52 = vsel %vm509_vm4, %v4499_v31, -inf }
 0x2ff   :  { %v500_v28 = vpop.f32.mrf.mxu0  ;;  %v521_v5 = vmax.f32 %v513_v35, %v520_v52 }
 0x300   :  { %v518_v50 = vsel %vm509_vm4, %v500_v28, -inf }
 0x301   :  { %v519_v60 = vmax.f32 %v512_v34, %v518_v50  ;;  %v5335_v39 = vpop.trf.xlu0 }
 0x303   :  { %v523_v54 = vmax.f32 %v519_v60, %v521_v5 }
 0x305   :  { %v524_v46 = vmax.f32 %v522_v1, %v523_v54  ;;  %v5337_v44 = vpop.trf.xlu0 }
 0x307   :  { %v525_v7 = vrot.slane %v524_v46, 4 }
 0x309   :  { %v526_v51 = vmax.f32 %v524_v46, %v525_v7  ;;  %v5339_v43 = vpop.trf.xlu0 }
 0x30b   :  { %v527_v29 = vrot.slane %v526_v51, 2 }
 0x30d   :  { %v528_v26 = vmax.f32 %v526_v51, %v527_v29  ;;  %v5341_v24 = vpop.trf.xlu0 }
 0x30e   :  { %6026 = vst [vmem:[#allocation24_spill] sm:$0xff] %v5341_v24  ;;  %3310 = vrot.lane.b32.xlu1 %v5192_v47, %s5046_s15 }
 0x30f   :  { %v529_v32 = vrot.slane %v528_v26, 1 }
 0x311   :  { %v530_v34 = vmax.f32 %v528_v26, %v529_v32  ;;  %v5345_v35 = vpop.trf.xlu0 }
 0x313   :  { %v531_v40 = vsub.f32 %v470_v56, %v530_v34  ;;  %v532_v49 = vsub.f32 %v4490_v53, %v530_v34  ;;  %v533_v50 = vsub.f32 %v480_v62, %v530_v34  ;;  %v534_v54 = vsub.f32 %v4493_v58, %v530_v34 }
 0x314   :  { %v535_v60 = vsub.f32 %v490_v3, %v530_v34  ;;  %v536_v1 = vsub.f32 %v4496_v63, %v530_v34  ;;  %v538_v29 = vsub.f32 %v4499_v31, %v530_v34  ;;  %v537_v51 = vsub.f32 %v500_v28, %v530_v34 }
 0x315   :  { %v539_v46 = vmul.f32 1.442695, %v531_v40  ;;  %v541_v5 = vmul.f32 1.442695, %v532_v49  ;;  %v543_v41 = vmul.f32 1.442695, %v533_v50  ;;  %v5347_v52 = vpop.trf.xlu0 }
 0x316   :  { %v545_v7 = vmul.f32 1.442695, %v534_v54  ;;  %v547_v24 = vmul.f32 1.442695, %v535_v60  ;;  %v549_v26 = vmul.f32 1.442695, %v536_v1 }
 0x317   :  { %4871 = vpow2.f32 %v539_v46  ;;  %v553_v53 = vmul.f32 1.442695, %v538_v29  ;;  %v551_v56 = vmul.f32 1.442695, %v537_v51 }
 0x318   :  { %4873 = vpow2.f32 %v541_v5 }
 0x319   :  { %4875 = vpow2.f32 %v543_v41  ;;  %v5349_v32 = vpop.trf.xlu0 }
 0x31a   :  { %4877 = vpow2.f32 %v545_v7 }
 0x31b   :  { %4879 = vpow2.f32 %v547_v24 }
 0x31c   :  { %4881 = vpow2.f32 %v549_v26  ;;  %v6027_v26 = vmov 0.0  }
 0x31d   :  { %4883 = vpow2.f32 %v553_v53  ;;  %v5351_v58 = vpop.trf.xlu0 }
 0x31e   :  { %4885 = vpow2.f32 %v551_v56 }
 0x321   :  { %v5353_v63 = vpop.trf.xlu0 }
 0x324   :  { %v4872_v62 = vpop.eup %4871 }
 0x325   :  { %v4874_v3 = vpop.eup %4873  ;;  %v555_v28 = vsel %vm509_vm4, %v4872_v62, 0.0  ;;  %v5359_v46 = vpop.trf.xlu0 }
 0x326   :  { %v4876_v31 = vpop.eup %4875  ;;  %v556_v34 = vsel %vm509_vm4, %v4874_v3, 0.0 }
 0x327   :  { %v4878_v40 = vpop.eup %4877  ;;  %v557_v49 = vadd.f32 %v556_v34, %v555_v28  ;;  %v558_v50 = vsel %vm509_vm4, %v4876_v31, 0.0 }
 0x328   :  { %v4880_v24 = vpop.eup %4879  ;;  %v560_v1 = vsel %vm509_vm4, %v4878_v40, 0.0 }
 0x329   :  { %v559_v54 = vadd.f32 %v558_v50, %v557_v49  ;;  %v4882_v60 = vpop.eup %4881  ;;  %v562_v29 = vsel %vm509_vm4, %v4880_v24, 0.0  ;;  %v5366_v34 = vpop.trf.xlu0 }
 0x32a   :  { %v4884_v5 = vpop.eup %4883  ;;  %v564_v53 = vsel %vm509_vm4, %v4882_v60, 0.0 }
 0x32b   :  { %v561_v41 = vadd.f32 %v560_v1, %v559_v54  ;;  %4501 = vmatpush3.msra.mxu0 %v4884_v5  ;;  %v4886_v7 = vpop.eup %4885  ;;  %v568_v50 = vsel %vm509_vm4, %v4884_v5, 0.0 }
 0x32c   :  { %4502 = vmatprep.subr.mxu0 %v6027_v26  ;;  %v566_v28 = vsel %vm509_vm4, %v4886_v7, 0.0 }
 0x32d   :  { %v563_v51 = vadd.f32 %v562_v29, %v561_v41  ;;  %4503 = vmatpush3.msra.mxu0 %v4886_v7  ;;  %v5372_v1 = vpop.trf.xlu0 }
 0x32e   :  { %4504 = vmatprep.subr.mxu0 %v6027_v26  ;;  %6028 = vst [vmem:[#allocation25_spill] sm:$0xff] %v5372_v1 }
 0x32f   :  { %v565_v56 = vadd.f32 %v564_v53, %v563_v51  ;;  %4505 = vmatpush3.msra.mxu0 %v4882_v60 }
 0x330   :  { %4506 = vmatprep.subr.mxu0 %v6027_v26 }
 0x331   :  { %v567_v49 = vadd.f32 %v566_v28, %v565_v56  ;;  %4507 = vmatpush3.msra.mxu0 %v4880_v24 }
 0x332   :  { %4508 = vmatprep.subr.mxu0 %v6027_v26 }
 0x333   :  { %v569_v54 = vadd.f32 %v568_v50, %v567_v49  ;;  %4509 = vmatpush3.msra.mxu0 %v4878_v40  ;;  %v5382_v40 = vpop.trf.xlu0 }
 0x334   :  { %4510 = vmatprep.subr.mxu0 %v6027_v26  ;;  %6029 = vst [vmem:[#allocation26_spill] sm:$0xff] %v5382_v40 }
 0x335   :  { %4511 = vmatpush3.msra.mxu0 %v4876_v31 }
 0x336   :  { %4512 = vmatprep.subr.mxu0 %v6027_v26 }
 0x337   :  { %4513 = vmatpush3.msra.mxu0 %v4874_v3 }
 0x338   :  { %4514 = vmatprep.subr.mxu0 %v6027_v26 }
 0x339   :  { %4515 = vmatpush3.msra.mxu0 %v4872_v62 }
 0x33a   :  { %4517 = vmatmul.mubr.msk.f32.vlgmr.msra.gmra.mxu0 %vm509_vm4, %v5255_v17  ;;  %4519 = vmatprep.subr.mxu0 %v5190_v45  ;;  %v5390_v17 = vpop.trf.xlu0 }
 0x33b   :  { %4520 = vmatpush3.msra.mxu0 %v5190_v45  ;;  %4521 = vmatprep.mubr.msk.f32.mxu0 %vm379_vm2, %v5210_v55 }
 0x33c   :  { %4568 = vmatprep.subr.mxu0 %v5194_v48 }
 0x33e   :  { %4522 = vmatmul.mubr.msk.f32.vlgmr.msra.gmra.mxu0 %vm379_vm2, %v5213_v57  ;;  %v5400_v45 = vpop.trf.xlu0 }
 0x33f   :  { %4569 = vmatpush3.msra.mxu0 %v5194_v48  ;;  %4524 = vmatprep.mubr.msk.f32.mxu0 %vm379_vm2, %v5216_v59  ;;  %6030 = vst [vmem:[#allocation27_spill] sm:$0xff] %v5400_v45  ;;  %v33_v59 = vld [vmem:[%s5988_s3 + $0x50] sm:$0xff] }
 0x340   :  { %4483 = vmatprep.mubr.msk.f32.mxu1 %vm185_vm1, %v33_v59 }
 0x342   :  { %4525 = vmatmul.mubr.msk.f32.gmra.mxu0 %vm379_vm2, %v5219_v61  ;;  %v5406_v48 = vpop.trf.xlu0  ;;  %v34_v61 = vld [vmem:[%s5988_s3 + $0x58] sm:$0xff] }
 0x343   :  { %4527 = vmatprep.mubr.msk.f32.mxu0 %vm379_vm2, %v5225_v0  ;;  %6031 = vst [vmem:[#allocation28_spill] sm:$0xff] %v5406_v48  ;;  %4484 = vmatmul.mubr.msk.f32.gmra.mxu1 %vm185_vm1, %v34_v61  ;;  %v570_v0 = vrot.slane %v569_v54, 4 }
 0x344   :  { %4549 = vmatprep.mubr.msk.f32.mxu1 %vm5048_vm3, %v6027_v26 }
 0x346   :  { %4528 = vmatmul.mubr.msk.f32.gmra.mxu0 %vm379_vm2, %v5228_v2  ;;  %v5414_v55 = vpop.trf.xlu0  ;;  %v571_v2 = vadd.f32 %v570_v0, %v569_v54 }
 0x347   :  { %4530 = vmatprep.mubr.msk.f32.mxu0 %vm379_vm2, %v5231_v4  ;;  %6032 = vst [vmem:[#allocation29_spill] sm:$0xff] %v5414_v55 }
 0x348   :  { %v572_v4 = vrot.slane %v571_v2, 2 }
 0x34a   :  { %4531 = vmatmul.mubr.msk.f32.gmra.mxu0 %vm379_vm2, %v5234_v6  ;;  %v573_v6 = vadd.f32 %v572_v4, %v571_v2 }
 0x34b   :  { %4570 = vmatprep.mubr.msk.f32.mxu0 %vm379_vm2, %v5245_v12 }
 0x34c   :  { %v574_v12 = vrot.slane %v573_v6, 1 }
 0x34e   :  { %4571 = vmatmul.mubr.msk.f32.vlgmr.msra.gmra.mxu0 %vm379_vm2, %v5253_v16  ;;  %v575_v16 = vadd.f32 %v574_v12, %v573_v6 }
 0x34f   :  { %4573 = vmatprep.mubr.msk.f32.mxu0 %vm379_vm2, %v5261_v19 }
 0x350   :  { %4887 = vrcp.f32 %v575_v16 }
 0x352   :  { %4574 = vmatmul.mubr.msk.f32.gmra.mxu0 %vm379_vm2, %v5267_v21 }
 0x353   :  { %4576 = vmatprep.mubr.msk.f32.mxu0 %vm379_vm2, %v5272_v23 }
 0x356   :  { %4577 = vmatmul.mubr.msk.f32.gmra.mxu0 %vm379_vm2, %v5278_v25 }
 0x357   :  { %4579 = vmatprep.mubr.msk.f32.mxu0 %vm379_vm2, %v5282_v27 }
 0x35a   :  { %v3275_v57 = vpop.permute.xlu0 %3274  ;;  %4580 = vmatmul.mubr.msk.f32.gmra.mxu0 %vm379_vm2, %v5286_v30 }
 0x35b   :  { %3277 = vxpose.xlu0.b32.start.end [1/1] (short) (narrow) %v3275_v57, 64  ;;  %4603 = vmatprep.mubr.msk.f32.mxu0 %vm379_vm2, %v5301_v42 }
 0x35d   :  { %v4888_v19 = vpop.eup %4887 }
 0x3fa   :  { %v645_v21 = vpop.f32.mrf.mxu0 }
 0x3fb   :  { %v5436_v23 = vmul.f32 %v4888_v19, %v645_v21 }
 0x3fc   :  { %v4518_v25 = vpop.f32.mrf.mxu0 }
 0x3fe   :  { %v4523_v27 = vpop.f32.mrf.mxu0 }
 0x3ff   :  { %v813_v56 = vsel %vm509_vm4, %v4523_v27, -inf }
 0x400   :  { %v773_v30 = vpop.f32.mrf.mxu0 }
 0x401   :  { %v812_v41 = vsel %vm509_vm4, %v773_v30, -inf }
 0x402   :  { %v4526_v62 = vpop.f32.mrf.mxu0 }
 0x403   :  { %v815_v28 = vsel %vm509_vm4, %v4526_v62, -inf }
 0x404   :  { %v783_v3 = vpop.f32.mrf.mxu0 }
 0x405   :  { %v814_v49 = vsel %vm509_vm4, %v783_v3, -inf }
 0x406   :  { %v4529_v31 = vpop.f32.mrf.mxu0 }
 0x407   :  { %v818_v29 = vsel %vm509_vm4, %v4529_v31, -inf }
 0x408   :  { %v793_v24 = vpop.f32.mrf.mxu0  ;;  %v819_v54 = vmax.f32 %v813_v56, %v818_v29 }
 0x409   :  { %v816_v60 = vsel %vm509_vm4, %v793_v24, -inf }
 0x40a   :  { %v4532_v5 = vpop.f32.mrf.mxu0  ;;  %v817_v51 = vmax.f32 %v812_v41, %v816_v60 }
 0x40b   :  { %v822_v7 = vsel %vm509_vm4, %v4532_v5, -inf }
 0x40c   :  { %v803_v53 = vpop.f32.mrf.mxu0  ;;  %v823_v57 = vmax.f32 %v815_v28, %v822_v7  ;;  %v824_v61 = vmax.f32 %v817_v51, %v819_v54 }
 0x40d   :  { %v820_v50 = vsel %vm509_vm4, %v803_v53, -inf }
 0x40e   :  { %v821_v59 = vmax.f32 %v814_v49, %v820_v50 }
 0x410   :  { %v825_v0 = vmax.f32 %v821_v59, %v823_v57 }
 0x412   :  { %v826_v2 = vmax.f32 %v824_v61, %v825_v0 }
 0x414   :  { %v827_v4 = vrot.slane %v826_v2, 4 }
 0x416   :  { %v828_v6 = vmax.f32 %v826_v2, %v827_v4 }
 0x418   :  { %v829_v12 = vrot.slane %v828_v6, 2 }
 0x41a   :  { %v830_v16 = vmax.f32 %v828_v6, %v829_v12 }
 0x41c   :  { %v831_v19 = vrot.slane %v830_v16, 1 }
 0x41e   :  { %v832_v21 = vmax.f32 %v830_v16, %v831_v19 }
 0x420   :  { %v833_v25 = vsub.f32 %v773_v30, %v832_v21  ;;  %v834_v60 = vsub.f32 %v4523_v27, %v832_v21  ;;  %v835_v41 = vsub.f32 %v783_v3, %v832_v21  ;;  %v836_v42 = vsub.f32 %v4526_v62, %v832_v21 }
 0x421   :  { %v837_v55 = vsub.f32 %v793_v24, %v832_v21  ;;  %v838_v48 = vsub.f32 %v4529_v31, %v832_v21  ;;  %v840_v7 = vsub.f32 %v4532_v5, %v832_v21  ;;  %v839_v51 = vsub.f32 %v803_v53, %v832_v21  ;;  %v5465_v21 = vpop.f32.mrf.mxu1 }
 0x422   :  { %v841_v45 = vmul.f32 1.442695, %v833_v25  ;;  %v843_v40 = vmul.f32 1.442695, %v834_v60  ;;  %v845_v29 = vmul.f32 1.442695, %v835_v41  ;;  %3508 = vrot.lane.b32.xlu1 %v5465_v21, %s5046_s15  ;;  %v5473_v60 = vpop.f32.mrf.mxu0 }
 0x423   :  { %v847_v56 = vmul.f32 1.442695, %v836_v42  ;;  %v849_v28 = vmul.f32 1.442695, %v837_v55  ;;  %v851_v49 = vmul.f32 1.442695, %v838_v48  ;;  %v5469_v25 = vpop.f32.mrf.mxu1 }
 0x424   :  { %4889 = vpow2.f32 %v841_v45  ;;  %v855_v50 = vmul.f32 1.442695, %v840_v7  ;;  %v853_v30 = vmul.f32 1.442695, %v839_v51  ;;  %3108 = vrot.lane.b32.xlu0 %v5469_v25, %s5046_s15  ;;  %v5475_v41 = vpop.f32.mrf.mxu0 }
 0x425   :  { %4891 = vpow2.f32 %v843_v40 }
 0x426   :  { %4893 = vpow2.f32 %v845_v29  ;;  %v4575_v29 = vpop.f32.mrf.mxu0 }
 0x427   :  { %4895 = vpow2.f32 %v847_v56 }
 0x428   :  { %4897 = vpow2.f32 %v849_v28  ;;  %v1343_v7 = vpop.f32.mrf.mxu0 }
 0x429   :  { %4899 = vpow2.f32 %v851_v49  ;;  %v1373_v49 = vsel %vm509_vm4, %v5473_v60, -inf }
 0x42a   :  { %4901 = vpow2.f32 %v855_v50  ;;  %v1372_v50 = vsel %vm509_vm4, %v5475_v41, -inf }
 0x42b   :  { %4903 = vpow2.f32 %v853_v30  ;;  %v1375_v30 = vsel %vm509_vm4, %v4575_v29, -inf }
 0x431   :  { %v4890_v27 = vpop.eup %4889 }
 0x432   :  { %v4892_v62 = vpop.eup %4891  ;;  %v857_v3 = vsel %vm509_vm4, %v4890_v27, 0.0 }
 0x433   :  { %v4894_v31 = vpop.eup %4893  ;;  %v858_v42 = vsel %vm509_vm4, %v4892_v62, 0.0 }
 0x434   :  { %v4896_v45 = vpop.eup %4895  ;;  %v859_v24 = vadd.f32 %v858_v42, %v857_v3  ;;  %v860_v40 = vsel %vm509_vm4, %v4894_v31, 0.0 }
 0x435   :  { %v4898_v55 = vpop.eup %4897  ;;  %v862_v53 = vsel %vm509_vm4, %v4896_v45, 0.0 }
 0x436   :  { %v861_v48 = vadd.f32 %v860_v40, %v859_v24  ;;  %v4900_v5 = vpop.eup %4899  ;;  %v864_v59 = vsel %vm509_vm4, %v4898_v55, 0.0 }
 0x437   :  { %v4902_v54 = vpop.eup %4901  ;;  %v866_v2 = vsel %vm509_vm4, %v4900_v5, 0.0 }
 0x438   :  { %v863_v57 = vadd.f32 %v862_v53, %v861_v48  ;;  %4534 = vmatpush3.msra.mxu1 %v4902_v54  ;;  %v4904_v61 = vpop.eup %4903  ;;  %v870_v16 = vsel %vm509_vm4, %v4902_v54, 0.0 }
 0x439   :  { %4535 = vmatprep.subr.mxu1 %v6027_v26  ;;  %v868_v6 = vsel %vm509_vm4, %v4904_v61, 0.0 }
 0x43a   :  { %v865_v0 = vadd.f32 %v864_v59, %v863_v57  ;;  %4536 = vmatpush3.msra.mxu1 %v4904_v61 }
 0x43b   :  { %4537 = vmatprep.subr.mxu1 %v6027_v26 }
 0x43c   :  { %v867_v4 = vadd.f32 %v866_v2, %v865_v0  ;;  %4538 = vmatpush3.msra.mxu1 %v4900_v5 }
 0x43d   :  { %4539 = vmatprep.subr.mxu1 %v6027_v26 }
 0x43e   :  { %v869_v12 = vadd.f32 %v868_v6, %v867_v4  ;;  %4540 = vmatpush3.msra.mxu1 %v4898_v55 }
 0x43f   :  { %4541 = vmatprep.subr.mxu1 %v6027_v26 }
 0x440   :  { %v871_v19 = vadd.f32 %v870_v16, %v869_v12  ;;  %4542 = vmatpush3.msra.mxu1 %v4896_v45 }
 0x441   :  { %4543 = vmatprep.subr.mxu1 %v6027_v26 }
 0x442   :  { %4544 = vmatpush3.msra.mxu1 %v4894_v31  ;;  %v872_v53 = vrot.slane %v871_v19, 4 }
 0x443   :  { %4545 = vmatprep.subr.mxu1 %v6027_v26 }
 0x444   :  { %4546 = vmatpush3.msra.mxu1 %v4892_v62  ;;  %v873_v57 = vadd.f32 %v872_v53, %v871_v19 }
 0x445   :  { %4547 = vmatprep.subr.mxu1 %v6027_v26 }
 0x446   :  { %4548 = vmatpush3.msra.mxu1 %v4890_v27  ;;  %v1374_v27 = vsel %vm509_vm4, %v1343_v7, -inf  ;;  %v874_v61 = vrot.slane %v873_v57, 2 }
 0x447   :  { %4550 = vmatmul.mubr.msk.f32.vlgmr.msra.gmra.mxu1 %vm509_vm4, %v5249_v14  ;;  %v4578_v14 = vpop.f32.mrf.mxu0 }
 0x448   :  { %4554 = vmatprep.mubr.msk.f32.mxu1 %vm379_vm2, %v5237_v8  ;;  %v1378_v62 = vsel %vm509_vm4, %v4578_v14, -inf  ;;  %v875_v2 = vadd.f32 %v874_v61, %v873_v57  ;;  %v6034_v57 = vld [vmem:[#allocation11_spill] sm:$0xff] }
 0x449   :  { %v1353_v56 = vpop.f32.mrf.mxu0  ;;  %v1379_v45 = vmax.f32 %v1373_v49, %v1378_v62 }
 0x44a   :  { %v1376_v3 = vsel %vm509_vm4, %v1353_v56, -inf  ;;  %v876_v6 = vrot.slane %v875_v2, 1 }
 0x44b   :  { %v4581_v51 = vpop.f32.mrf.mxu0  ;;  %v1377_v24 = vmax.f32 %v1372_v50, %v1376_v3 }
 0x44c   :  { %v1382_v31 = vsel %vm509_vm4, %v4581_v51, -inf  ;;  %v877_v16 = vadd.f32 %v876_v6, %v875_v2 }
 0x44d   :  { %v1363_v28 = vpop.f32.mrf.mxu0  ;;  %v1383_v40 = vmax.f32 %v1375_v30, %v1382_v31  ;;  %v1384_v48 = vmax.f32 %v1377_v24, %v1379_v45 }
 0x44e   :  { %v1380_v42 = vsel %vm509_vm4, %v1363_v28, -inf  ;;  %4905 = vrcp.f32 %v877_v16 }
 0x44f   :  { %v1381_v55 = vmax.f32 %v1374_v27, %v1380_v42 }
 0x451   :  { %v1385_v5 = vmax.f32 %v1381_v55, %v1383_v40 }
 0x453   :  { %v1386_v54 = vmax.f32 %v1384_v48, %v1385_v5 }
 0x455   :  { %v1387_v59 = vrot.slane %v1386_v54, 4 }
 0x457   :  { %v1388_v0 = vmax.f32 %v1386_v54, %v1387_v59 }
 0x459   :  { %v1389_v4 = vrot.slane %v1388_v0, 2 }
 0x45b   :  { %v1390_v12 = vmax.f32 %v1388_v0, %v1389_v4  ;;  %v4906_v31 = vpop.eup %4905 }
 0x45d   :  { %v1391_v8 = vrot.slane %v1390_v12, 1 }
 0x45f   :  { %v1392_v1 = vmax.f32 %v1390_v12, %v1391_v8 }
 0x461   :  { %v1400_v49 = vsub.f32 %v4581_v51, %v1392_v1  ;;  %v1399_v50 = vsub.f32 %v1363_v28, %v1392_v1  ;;  %v1398_v30 = vsub.f32 %v4578_v14, %v1392_v1  ;;  %v1397_v62 = vsub.f32 %v1353_v56, %v1392_v1 }
 0x462   :  { %v1396_v42 = vsub.f32 %v4575_v29, %v1392_v1  ;;  %v1395_v40 = vsub.f32 %v1343_v7, %v1392_v1  ;;  %v1394_v5 = vsub.f32 %v5473_v60, %v1392_v1  ;;  %v1393_v29 = vsub.f32 %v5475_v41, %v1392_v1 }
 0x463   :  { %v1415_v27 = vmul.f32 1.442695, %v1400_v49  ;;  %v1413_v3 = vmul.f32 1.442695, %v1399_v50  ;;  %v1411_v19 = vmul.f32 1.442695, %v1398_v30 }
 0x464   :  { %v1409_v55 = vmul.f32 1.442695, %v1397_v62  ;;  %v1407_v8 = vmul.f32 1.442695, %v1396_v42  ;;  %v1405_v14 = vmul.f32 1.442695, %v1395_v40 }
 0x465   :  { %4907 = vpow2.f32 %v1415_v27  ;;  %v1403_v60 = vmul.f32 1.442695, %v1394_v5  ;;  %v1401_v7 = vmul.f32 1.442695, %v1393_v29 }
 0x466   :  { %4909 = vpow2.f32 %v1413_v3 }
 0x467   :  { %4911 = vpow2.f32 %v1411_v19 }
 0x468   :  { %4913 = vpow2.f32 %v1409_v55 }
 0x469   :  { %4915 = vpow2.f32 %v1407_v8 }
 0x46a   :  { %4917 = vpow2.f32 %v1405_v14 }
 0x46b   :  { %4919 = vpow2.f32 %v1403_v60 }
 0x46c   :  { %4921 = vpow2.f32 %v1401_v7 }
 0x472   :  { %v4908_v1 = vpop.eup %4907 }
 0x473   :  { %v1430_v49 = vsel %vm509_vm4, %v4908_v1, 0.0 }
 0x507   :  { %v947_v45 = vpop.f32.mrf.mxu1 }
 0x508   :  { %v952_v24 = vmul.f32 %v4906_v31, %v947_v45 }
 0x509   :  { %v4551_v48 = vpop.f32.mrf.mxu1 }
 0x50a   :  { %4552 = vmatprep.subr.mxu1 %v952_v24 }
 0x50b   :  { %4553 = vmatpush3.msra.mxu1 %v952_v24 }
 0x50c   :  { %4555 = vmatmul.mubr.msk.f32.vlgmr.msra.gmra.mxu1 %vm379_vm2, %v5239_v9  ;;  %4560 = vmatprep.subr.mxu1 %v5436_v23 }
 0x50d   :  { %4557 = vmatprep.mubr.msk.f32.mxu1 %vm379_vm2, %v5241_v10  ;;  %4561 = vmatpush3.msra.mxu1 %v5436_v23  ;;  %v4910_v23 = vpop.eup %4909 }
 0x50e   :  { %4582 = vmatprep.subr.mxu1 %v6027_v26  ;;  %v4912_v41 = vpop.eup %4911  ;;  %v1428_v12 = vsel %vm509_vm4, %v4910_v23, 0.0 }
 0x50f   :  { %v4914_v56 = vpop.eup %4913  ;;  %v1426_v4 = vsel %vm509_vm4, %v4912_v41, 0.0 }
 0x510   :  { %4558 = vmatmul.mubr.msk.f32.gmra.mxu1 %vm379_vm2, %v5243_v11  ;;  %v4916_v51 = vpop.eup %4915  ;;  %v1424_v0 = vsel %vm509_vm4, %v4914_v56, 0.0 }
 0x511   :  { %4562 = vmatprep.mubr.msk.f32.mxu1 %vm379_vm2, %v5288_v33  ;;  %v4918_v28 = vpop.eup %4917  ;;  %v1422_v59 = vsel %vm509_vm4, %v4916_v51, 0.0 }
 0x512   :  { %v4920_v53 = vpop.eup %4919 }
 0x513   :  { %v4922_v54 = vpop.eup %4921 }
 0x514   :  { %4563 = vmatmul.mubr.msk.f32.vlgmr.msra.gmra.mxu1 %vm379_vm2, %v5290_v36 }
 0x515   :  { %4583 = vmatpush3.msra.mxu1 %v4908_v1  ;;  %4565 = vmatprep.mubr.msk.f32.mxu1 %vm379_vm2, %v5292_v37 }
 0x516   :  { %4584 = vmatprep.subr.mxu1 %v6027_v26 }
 0x517   :  { %4585 = vmatpush3.msra.mxu1 %v4910_v23 }
 0x518   :  { %4586 = vmatprep.subr.mxu1 %v6027_v26  ;;  %4566 = vmatmul.mubr.msk.f32.gmra.mxu1 %vm379_vm2, %v5294_v38 }
 0x519   :  { %4587 = vmatpush3.msra.mxu1 %v4912_v41  ;;  %4598 = vmatprep.mubr.msk.f32.mxu1 %vm5048_vm3, %v6027_v26 }
 0x51a   :  { %4588 = vmatprep.subr.mxu1 %v6027_v26 }
 0x51b   :  { %4589 = vmatpush3.msra.mxu1 %v4914_v56 }
 0x51c   :  { %4590 = vmatprep.subr.mxu1 %v6027_v26 }
 0x51d   :  { %4591 = vmatpush3.msra.mxu1 %v4916_v51 }
 0x51e   :  { %4592 = vmatprep.subr.mxu1 %v6027_v26 }
 0x51f   :  { %4593 = vmatpush3.msra.mxu1 %v4918_v28 }
 0x520   :  { %4594 = vmatprep.subr.mxu1 %v6027_v26 }
 0x521   :  { %4595 = vmatpush3.msra.mxu1 %v4920_v53 }
 0x522   :  { %4596 = vmatprep.subr.mxu1 %v6027_v26 }
 0x523   :  { %4597 = vmatpush3.msra.mxu1 %v4922_v54 }
 0x524   :  { %4599 = vmatmul.mubr.msk.f32.vlgmr.msra.gmra.mxu1 %vm509_vm4, %v5469_v25  ;;  %4609 = vmatprep.subr.mxu1 %v5192_v47  ;;  %v6033_v25 = vld [vmem:[#allocation10_spill] sm:$0xff] }
 0x525   :  { %4610 = vmatpush3.msra.mxu1 %v5192_v47  ;;  %4611 = vmatprep.mubr.msk.f32.mxu1 %vm379_vm2, %v5247_v13  ;;  %v6035_v47 = vld [vmem:[#allocation12_spill] sm:$0xff]  ;;  %v1417_v13 = vsel %vm509_vm4, %v4922_v54, 0.0  ;;  %v6037_v54 = vld [vmem:[#allocation15_spill] sm:$0xff] }
 0x528   :  { %4612 = vmatmul.mubr.msk.f32.vlgmr.msra.gmra.mxu1 %vm379_vm2, %v5251_v15  ;;  %v1418_v15 = vsel %vm509_vm4, %v4920_v53, 0.0 }
 0x529   :  { %4614 = vmatprep.mubr.msk.f32.mxu1 %vm379_vm2, %v5257_v18  ;;  %v1419_v18 = vadd.f32 %v1418_v15, %v1417_v13 }
 0x52c   :  { %4615 = vmatmul.mubr.msk.f32.gmra.mxu1 %vm379_vm2, %v5263_v20  ;;  %v1420_v20 = vsel %vm509_vm4, %v4918_v28, 0.0  ;;  %v6036_v28 = vld [vmem:[#allocation14_spill] sm:$0xff] }
 0x52d   :  { %4617 = vmatprep.mubr.msk.f32.mxu1 %vm379_vm2, %v5269_v22  ;;  %v1421_v22 = vadd.f32 %v1420_v20, %v1419_v18 }
 0x52f   :  { %v1423_v61 = vadd.f32 %v1422_v59, %v1421_v22 }
 0x530   :  { %4618 = vmatmul.mubr.msk.f32.gmra.mxu1 %vm379_vm2, %v6033_v25 }
 0x531   :  { %4620 = vmatprep.mubr.msk.f32.mxu1 %vm379_vm2, %v6034_v57  ;;  %v1425_v2 = vadd.f32 %v1424_v0, %v1423_v61  ;;  %v6038_v57 = vld [vmem:[#allocation16_spill] sm:$0xff] }
 0x533   :  { %v1427_v6 = vadd.f32 %v1426_v4, %v1425_v2 }
 0x534   :  { %4621 = vmatmul.mubr.msk.f32.gmra.mxu1 %vm379_vm2, %v6035_v47 }
 0x535   :  { %4644 = vmatprep.mubr.msk.f32.mxu1 %vm379_vm2, %v5390_v17  ;;  %v1429_v16 = vadd.f32 %v1428_v12, %v1427_v6 }
 0x537   :  { %v1431_v50 = vadd.f32 %v1430_v49, %v1429_v16 }
 0x539   :  { %v1432_v30 = vrot.slane %v1431_v50, 4 }
 0x53b   :  { %v1433_v27 = vadd.f32 %v1432_v30, %v1431_v50 }
 0x53d   :  { %v1434_v62 = vrot.slane %v1433_v27, 2 }
 0x53f   :  { %v1435_v3 = vadd.f32 %v1434_v62, %v1433_v27 }
 0x541   :  { %v1436_v19 = vrot.slane %v1435_v3, 1 }
 0x543   :  { %v1437_v40 = vadd.f32 %v1436_v19, %v1435_v3 }
 0x545   :  { %4923 = vrcp.f32 %v1437_v40 }
 0x552   :  { %v4924_v1 = vpop.eup %4923 }
 0x5cc   :  { %v4556_v31 = vpop.f32.mrf.mxu1 }
 0x5ce   :  { %v1063_v42 = vpop.f32.mrf.mxu1 }
 0x5d0   :  { %v4559_v45 = vpop.f32.mrf.mxu1 }
 0x5d2   :  { %v1073_v24 = vpop.f32.mrf.mxu1 }
 0x5d4   :  { %v4564_v55 = vpop.f32.mrf.mxu1 }
 0x5d5   :  { %v5545_v48 = vadd.f32 %v4564_v55, %v4556_v31 }
 0x5d6   :  { %v1192_v5 = vpop.f32.mrf.mxu1 }
 0x5d7   :  { %v5547_v8 = vadd.f32 %v1192_v5, %v1063_v42 }
 0x5d8   :  { %v4567_v29 = vpop.f32.mrf.mxu1 }
 0x5d9   :  { %v5549_v14 = vadd.f32 %v4567_v29, %v4559_v45 }
 0x5da   :  { %v1202_v60 = vpop.f32.mrf.mxu1 }
 0x5db   :  { %v5551_v7 = vadd.f32 %v1202_v60, %v1073_v24 }
 0x5e4   :  { %v1507_v23 = vpop.f32.mrf.mxu1 }
 0x5e5   :  { %v1512_v41 = vmul.f32 %v4924_v1, %v1507_v23 }
 0x5e6   :  { %v4600_v56 = vpop.f32.mrf.mxu1 }
 0x5e7   :  { %4601 = vmatprep.subr.mxu0 %v1512_v41 }
 0x5e8   :  { %4602 = vmatpush3.msra.mxu0 %v1512_v41  ;;  %v4613_v51 = vpop.f32.mrf.mxu1 }
 0x5e9   :  { %4604 = vmatmul.mubr.msk.f32.vlgmr.msra.gmra.mxu0 %vm379_vm2, %v6036_v28  ;;  %4623 = vmatprep.subr.mxu0 %v6027_v26  ;;  %v1808_v4 = vsel %vm509_vm4, %v4613_v51, -inf }
 0x5ea   :  { %v1768_v53 = vpop.f32.mrf.mxu1  ;;  %4606 = vmatprep.mubr.msk.f32.mxu0 %vm379_vm2, %v6037_v54 }
 0x5eb   :  { %v1807_v22 = vsel %vm509_vm4, %v1768_v53, -inf }
 0x5ec   :  { %v4616_v25 = vpop.f32.mrf.mxu1 }
 0x5ed   :  { %4607 = vmatmul.mubr.msk.f32.gmra.mxu0 %vm379_vm2, %v6038_v57  ;;  %v1810_v6 = vsel %vm509_vm4, %v4616_v25, -inf }
 0x5ee   :  { %v1778_v47 = vpop.f32.mrf.mxu1  ;;  %4639 = vmatprep.mubr.msk.f32.mxu0 %vm5048_vm3, %v6027_v26 }
 0x5ef   :  { %v1809_v12 = vsel %vm509_vm4, %v1778_v47, -inf }
 0x5f0   :  { %v4619_v13 = vpop.f32.mrf.mxu1 }
 0x5f1   :  { %v1813_v59 = vsel %vm509_vm4, %v4619_v13, -inf }
 0x5f2   :  { %v1788_v15 = vpop.f32.mrf.mxu1  ;;  %v1814_v49 = vmax.f32 %v1808_v4, %v1813_v59 }
 0x5f3   :  { %v1811_v18 = vsel %vm509_vm4, %v1788_v15, -inf }
 0x5f4   :  { %v4622_v20 = vpop.f32.mrf.mxu1  ;;  %v1812_v0 = vmax.f32 %v1807_v22, %v1811_v18 }
 0x5f5   :  { %v1817_v61 = vsel %vm509_vm4, %v4622_v20, -inf }
 0x5f6   :  { %v1798_v2 = vpop.f32.mrf.mxu1  ;;  %v1818_v50 = vmax.f32 %v1810_v6, %v1817_v61  ;;  %v1819_v27 = vmax.f32 %v1812_v0, %v1814_v49 }
 0x5f7   :  { %v1815_v16 = vsel %vm509_vm4, %v1798_v2, -inf }
 0x5f8   :  { %v1816_v30 = vmax.f32 %v1809_v12, %v1815_v16 }
 0x5fa   :  { %v1820_v62 = vmax.f32 %v1816_v30, %v1818_v50 }
 0x5fc   :  { %v1821_v3 = vmax.f32 %v1819_v27, %v1820_v62 }
 0x5fe   :  { %v1822_v31 = vrot.slane %v1821_v3, 4 }
 0x600   :  { %v1823_v42 = vmax.f32 %v1821_v3, %v1822_v31 }
 0x602   :  { %v1824_v19 = vrot.slane %v1823_v42, 2 }
 0x604   :  { %v1825_v45 = vmax.f32 %v1823_v42, %v1824_v19 }
 0x606   :  { %v1826_v24 = vrot.slane %v1825_v45, 1 }
 0x608   :  { %v1827_v40 = vmax.f32 %v1825_v45, %v1826_v24 }
 0x60a   :  { %v1828_v55 = vsub.f32 %v1768_v53, %v1827_v40  ;;  %v1829_v5 = vsub.f32 %v4613_v51, %v1827_v40  ;;  %v1830_v29 = vsub.f32 %v1778_v47, %v1827_v40  ;;  %v1831_v60 = vsub.f32 %v4616_v25, %v1827_v40 }
 0x60b   :  { %v1832_v1 = vsub.f32 %v1788_v15, %v1827_v40  ;;  %v1833_v23 = vsub.f32 %v4619_v13, %v1827_v40  ;;  %v1835_v22 = vsub.f32 %v4622_v20, %v1827_v40  ;;  %v1834_v61 = vsub.f32 %v1798_v2, %v1827_v40 }
 0x60c   :  { %v1836_v41 = vmul.f32 1.442695, %v1828_v55  ;;  %v1838_v56 = vmul.f32 1.442695, %v1829_v5  ;;  %v1840_v18 = vmul.f32 1.442695, %v1830_v29 }
 0x60d   :  { %v1842_v59 = vmul.f32 1.442695, %v1831_v60  ;;  %v1844_v0 = vmul.f32 1.442695, %v1832_v1  ;;  %v1846_v4 = vmul.f32 1.442695, %v1833_v23 }
 0x60e   :  { %4925 = vpow2.f32 %v1836_v41  ;;  %v1850_v6 = vmul.f32 1.442695, %v1835_v22  ;;  %v1848_v53 = vmul.f32 1.442695, %v1834_v61  ;;  %v6039_v29 = vld [vmem:[#allocation19_spill] sm:$0xff]  ;;  %v6040_v60 = vld [vmem:[#allocation21_spill] sm:$0xff] }
 0x60f   :  { %4927 = vpow2.f32 %v1838_v56  ;;  %v6041_v1 = vld [vmem:[#allocation20_spill] sm:$0xff]  ;;  %v6042_v23 = vld [vmem:[#allocation22_spill] sm:$0xff]  ;;  %v6043_v41 = vld [vmem:[#allocation23_spill] sm:$0xff] }
 0x610   :  { %4929 = vpow2.f32 %v1840_v18 }
 0x611   :  { %4931 = vpow2.f32 %v1842_v59 }
 0x612   :  { %4933 = vpow2.f32 %v1844_v0 }
 0x613   :  { %4935 = vpow2.f32 %v1846_v4 }
 0x614   :  { %4937 = vpow2.f32 %v1850_v6 }
 0x615   :  { %4939 = vpow2.f32 %v1848_v53 }
 0x61b   :  { %v4926_v51 = vpop.eup %4925 }
 0x61c   :  { %v4928_v25 = vpop.eup %4927  ;;  %v1852_v47 = vsel %vm509_vm4, %v4926_v51, 0.0 }
 0x61d   :  { %v4930_v13 = vpop.eup %4929  ;;  %v1853_v15 = vsel %vm509_vm4, %v4928_v25, 0.0 }
 0x61e   :  { %v4932_v20 = vpop.eup %4931  ;;  %v1854_v2 = vadd.f32 %v1853_v15, %v1852_v47  ;;  %v1855_v12 = vsel %vm509_vm4, %v4930_v13, 0.0 }
 0x61f   :  { %v4934_v16 = vpop.eup %4933  ;;  %v1857_v30 = vsel %vm509_vm4, %v4932_v20, 0.0 }
 0x620   :  { %v1856_v49 = vadd.f32 %v1855_v12, %v1854_v2  ;;  %v4936_v50 = vpop.eup %4935  ;;  %v1859_v3 = vsel %vm509_vm4, %v4934_v16, 0.0 }
 0x621   :  { %v4938_v27 = vpop.eup %4937  ;;  %v1861_v19 = vsel %vm509_vm4, %v4936_v50, 0.0 }
 0x622   :  { %v1858_v62 = vadd.f32 %v1857_v30, %v1856_v49  ;;  %4624 = vmatpush3.msra.mxu0 %v4938_v27  ;;  %v4940_v31 = vpop.eup %4939  ;;  %v1865_v55 = vsel %vm509_vm4, %v4938_v27, 0.0 }
 0x623   :  { %4625 = vmatprep.subr.mxu0 %v6027_v26  ;;  %v1863_v24 = vsel %vm509_vm4, %v4940_v31, 0.0 }
 0x624   :  { %v1860_v42 = vadd.f32 %v1859_v3, %v1858_v62  ;;  %4626 = vmatpush3.msra.mxu0 %v4940_v31 }
 0x625   :  { %4627 = vmatprep.subr.mxu0 %v6027_v26 }
 0x626   :  { %v1862_v45 = vadd.f32 %v1861_v19, %v1860_v42  ;;  %4628 = vmatpush3.msra.mxu0 %v4936_v50 }
 0x627   :  { %4629 = vmatprep.subr.mxu0 %v6027_v26 }
 0x628   :  { %v1864_v40 = vadd.f32 %v1863_v24, %v1862_v45  ;;  %4630 = vmatpush3.msra.mxu0 %v4934_v16 }
 0x629   :  { %4631 = vmatprep.subr.mxu0 %v6027_v26 }
 0x62a   :  { %v1866_v5 = vadd.f32 %v1865_v55, %v1864_v40  ;;  %4632 = vmatpush3.msra.mxu0 %v4932_v20 }
 0x62b   :  { %4633 = vmatprep.subr.mxu0 %v6027_v26 }
 0x62c   :  { %4634 = vmatpush3.msra.mxu0 %v4930_v13  ;;  %v6050_v13 = vld [vmem:[#allocation29_spill] sm:$0xff] }
 0x62d   :  { %4635 = vmatprep.subr.mxu0 %v6027_v26 }
 0x62e   :  { %4636 = vmatpush3.msra.mxu0 %v4928_v25  ;;  %v6049_v25 = vld [vmem:[#allocation28_spill] sm:$0xff] }
 0x62f   :  { %4637 = vmatprep.subr.mxu0 %v6027_v26 }
 0x630   :  { %4638 = vmatpush3.msra.mxu0 %v4926_v51  ;;  %v6048_v51 = vld [vmem:[#allocation27_spill] sm:$0xff] }
 0x631   :  { %4640 = vmatmul.mubr.msk.f32.vlgmr.msra.gmra.mxu0 %vm509_vm4, %v5465_v21  ;;  %4650 = vmatprep.subr.mxu0 %v6039_v29  ;;  %v6044_v21 = vld [vmem:[#allocation24_spill] sm:$0xff] }
 0x632   :  { %4651 = vmatpush3.msra.mxu0 %v6039_v29  ;;  %4652 = vmatprep.mubr.msk.f32.mxu0 %vm379_vm2, %v6040_v60 }
 0x633   :  { %4683 = vmatprep.subr.mxu0 %v6041_v1 }
 0x635   :  { %4653 = vmatmul.mubr.msk.f32.vlgmr.msra.gmra.mxu0 %vm379_vm2, %v6042_v23 }
 0x636   :  { %4684 = vmatpush3.msra.mxu0 %v6041_v1  ;;  %4655 = vmatprep.mubr.msk.f32.mxu0 %vm379_vm2, %v6043_v41 }
 0x639   :  { %4656 = vmatmul.mubr.msk.f32.gmra.mxu0 %vm379_vm2, %v5335_v39  ;;  %v6047_v39 = vld [vmem:[#allocation9_spill] sm:$0xff] }
 0x63a   :  { %4658 = vmatprep.mubr.msk.f32.mxu0 %vm379_vm2, %v5337_v44  ;;  %v6046_v44 = vld [vmem:[#allocation26_spill] sm:$0xff] }
 0x63d   :  { %4659 = vmatmul.mubr.msk.f32.gmra.mxu0 %vm379_vm2, %v5339_v43  ;;  %v6045_v43 = vld [vmem:[#allocation25_spill] sm:$0xff] }
 0x63e   :  { %4661 = vmatprep.mubr.msk.f32.mxu0 %vm379_vm2, %v6044_v21 }
 0x641   :  { %4662 = vmatmul.mubr.msk.f32.gmra.mxu0 %vm379_vm2, %v5345_v35 }
 0x642   :  { %4685 = vmatprep.mubr.msk.f32.mxu0 %vm379_vm2, %v5347_v52 }
 0x645   :  { %4686 = vmatmul.mubr.msk.f32.vlgmr.msra.gmra.mxu0 %vm379_vm2, %v5349_v32 }
 0x646   :  { %4688 = vmatprep.mubr.msk.f32.mxu0 %vm379_vm2, %v5351_v58 }
 0x649   :  { %4689 = vmatmul.mubr.msk.f32.gmra.mxu0 %vm379_vm2, %v5353_v63 }
 0x64a   :  { %4691 = vmatprep.mubr.msk.f32.mxu0 %vm379_vm2, %v5359_v46 }
 0x64d   :  { %4692 = vmatmul.mubr.msk.f32.gmra.mxu0 %vm379_vm2, %v5366_v34  ;;  %v1867_v34 = vrot.slane %v1866_v5, 4 }
 0x64e   :  { %4694 = vmatprep.mubr.msk.f32.mxu0 %vm379_vm2, %v6045_v43 }
 0x64f   :  { %v1868_v56 = vadd.f32 %v1867_v34, %v1866_v5 }
 0x651   :  { %4695 = vmatmul.mubr.msk.f32.gmra.mxu0 %vm379_vm2, %v6046_v44  ;;  %v1869_v18 = vrot.slane %v1868_v56, 2 }
 0x652   :  { %4718 = vmatprep.mubr.msk.f32.mxu0 %vm379_vm2, %v6047_v39 }
 0x653   :  { %v1870_v22 = vadd.f32 %v1869_v18, %v1868_v56 }
 0x655   :  { %v1871_v59 = vrot.slane %v1870_v22, 1 }
 0x657   :  { %v1872_v61 = vadd.f32 %v1871_v59, %v1870_v22 }
 0x659   :  { %4941 = vrcp.f32 %v1872_v61 }
 0x666   :  { %v4942_v4 = vpop.eup %4941 }
 0x6a9   :  { %v4605_v35 = vpop.f32.mrf.mxu0 }
 0x6aa   :  { %v5626_v52 = vadd.f32 %v4605_v35, %v5545_v48 }
 0x6ab   :  { %v1623_v32 = vpop.f32.mrf.mxu0 }
 0x6ac   :  { %v5629_v58 = vadd.f32 %v1623_v32, %v5547_v8 }
 0x6ad   :  { %v4608_v63 = vpop.f32.mrf.mxu0 }
 0x6ae   :  { %v5632_v46 = vadd.f32 %v4608_v63, %v5549_v14 }
 0x6af   :  { %v5634_v0 = vpop.f32.mrf.mxu0 }
 0x6f1   :  { %v1942_v48 = vpop.f32.mrf.mxu0 }
 0x6f2   :  { %v1947_v6 = vmul.f32 %v4942_v4, %v1942_v48 }
 0x6f3   :  { %v4641_v53 = vpop.f32.mrf.mxu0 }
 0x6f4   :  { %4642 = vmatprep.subr.mxu1 %v1947_v6 }
 0x6f5   :  { %4643 = vmatpush3.msra.mxu1 %v1947_v6  ;;  %v4654_v8 = vpop.f32.mrf.mxu0 }
 0x6f6   :  { %4645 = vmatmul.mubr.msk.f32.vlgmr.msra.gmra.mxu1 %vm379_vm2, %v6048_v51  ;;  %4664 = vmatprep.subr.mxu1 %v6027_v26  ;;  %v2251_v3 = vsel %vm509_vm4, %v4654_v8, -inf }
 0x6f7   :  { %v2211_v14 = vpop.f32.mrf.mxu0  ;;  %4647 = vmatprep.mubr.msk.f32.mxu1 %vm379_vm2, %v6049_v25 }
 0x6f8   :  { %v2250_v49 = vsel %vm509_vm4, %v2211_v14, -inf }
 0x6f9   :  { %v4657_v47 = vpop.f32.mrf.mxu0 }
 0x6fa   :  { %4648 = vmatmul.mubr.msk.f32.gmra.mxu1 %vm379_vm2, %v6050_v13  ;;  %v2253_v31 = vsel %vm509_vm4, %v4657_v47, -inf }
 0x6fb   :  { %v2221_v15 = vpop.f32.mrf.mxu0  ;;  %4680 = vmatprep.mubr.msk.f32.mxu1 %vm5048_vm3, %v6027_v26 }
 0x6fc   :  { %v2252_v42 = vsel %vm509_vm4, %v2221_v15, -inf }
 0x6fd   :  { %v5645_v20 = vpop.f32.mrf.mxu0 }
 0x6fe   :  { %v2256_v50 = vsel %vm509_vm4, %v5645_v20, -inf }
 0x6ff   :  { %v2231_v2 = vpop.f32.mrf.mxu0  ;;  %v2257_v45 = vmax.f32 %v2251_v3, %v2256_v50 }
 0x700   :  { %v2254_v12 = vsel %vm509_vm4, %v2231_v2, -inf }
 0x701   :  { %v5648_v16 = vpop.f32.mrf.mxu0  ;;  %v2255_v27 = vmax.f32 %v2250_v49, %v2254_v12 }
 0x702   :  { %v2260_v30 = vsel %vm509_vm4, %v5648_v16, -inf }
 0x703   :  { %v2241_v62 = vpop.f32.mrf.mxu0  ;;  %v2261_v24 = vmax.f32 %v2253_v31, %v2260_v30  ;;  %v2262_v5 = vmax.f32 %v2255_v27, %v2257_v45 }
 0x704   :  { %v2258_v19 = vsel %vm509_vm4, %v2241_v62, -inf }
 0x705   :  { %v2259_v40 = vmax.f32 %v2252_v42, %v2258_v19  ;;  %v5659_v55 = vpop.f32.mrf.mxu0 }
 0x706   :  { %v2562_v12 = vsel %vm509_vm4, %v5659_v55, -inf }
 0x707   :  { %v2263_v29 = vmax.f32 %v2259_v40, %v2261_v24  ;;  %v5661_v60 = vpop.f32.mrf.mxu0 }
 0x708   :  { %v2561_v18 = vsel %vm509_vm4, %v5661_v60, -inf }
 0x709   :  { %v2264_v1 = vmax.f32 %v2262_v5, %v2263_v29  ;;  %v5663_v23 = vpop.f32.mrf.mxu0 }
 0x70a   :  { %v2564_v49 = vsel %vm509_vm4, %v5663_v23, -inf }
 0x70b   :  { %v2265_v41 = vrot.slane %v2264_v1, 4  ;;  %v5665_v21 = vpop.f32.mrf.mxu0 }
 0x70c   :  { %v2563_v4 = vsel %vm509_vm4, %v5665_v21, -inf }
 0x70d   :  { %v2266_v43 = vmax.f32 %v2264_v1, %v2265_v41  ;;  %v5667_v44 = vpop.f32.mrf.mxu0 }
 0x70e   :  { %v2567_v22 = vsel %vm509_vm4, %v5667_v44, -inf }
 0x70f   :  { %v2267_v39 = vrot.slane %v2266_v43, 2  ;;  %v5669_v35 = vpop.f32.mrf.mxu0  ;;  %v2568_v30 = vmax.f32 %v2562_v12, %v2567_v22 }
 0x710   :  { %v2565_v63 = vsel %vm509_vm4, %v5669_v35, -inf }
 0x711   :  { %v2268_v32 = vmax.f32 %v2266_v43, %v2267_v39  ;;  %v5673_v34 = vpop.f32.mrf.mxu0  ;;  %v2566_v48 = vmax.f32 %v2561_v18, %v2565_v63 }
 0x712   :  { %v2571_v59 = vsel %vm509_vm4, %v5673_v34, -inf }
 0x713   :  { %v2269_v56 = vrot.slane %v2268_v32, 1  ;;  %v5681_v61 = vpop.f32.mrf.mxu0  ;;  %v2572_v27 = vmax.f32 %v2564_v49, %v2571_v59  ;;  %v2573_v40 = vmax.f32 %v2566_v48, %v2568_v30 }
 0x714   :  { %v2569_v6 = vsel %vm509_vm4, %v5681_v61, -inf }
 0x715   :  { %v2270_v53 = vmax.f32 %v2268_v32, %v2269_v56  ;;  %v2570_v50 = vmax.f32 %v2563_v4, %v2569_v6 }
 0x717   :  { %v2271_v3 = vsub.f32 %v2211_v14, %v2270_v53  ;;  %v2272_v31 = vsub.f32 %v4654_v8, %v2270_v53  ;;  %v2273_v42 = vsub.f32 %v2221_v15, %v2270_v53  ;;  %v2274_v19 = vsub.f32 %v4657_v47, %v2270_v53 }
 0x718   :  { %v2275_v45 = vsub.f32 %v2231_v2, %v2270_v53  ;;  %v2276_v24 = vsub.f32 %v5645_v20, %v2270_v53  ;;  %v2574_v41 = vmax.f32 %v2570_v50, %v2572_v27  ;;  %v2278_v43 = vsub.f32 %v5648_v16, %v2270_v53 }
 0x719   :  { %v2279_v5 = vmul.f32 1.442695, %v2271_v3  ;;  %v2281_v29 = vmul.f32 1.442695, %v2272_v31  ;;  %v2283_v1 = vmul.f32 1.442695, %v2273_v42  ;;  %v2277_v63 = vsub.f32 %v2241_v62, %v2270_v53 }
 0x71a   :  { %v2285_v39 = vmul.f32 1.442695, %v2274_v19  ;;  %v2575_v32 = vmax.f32 %v2573_v40, %v2574_v41  ;;  %v2287_v56 = vmul.f32 1.442695, %v2275_v45  ;;  %v2289_v8 = vmul.f32 1.442695, %v2276_v24 }
 0x71b   :  { %4943 = vpow2.f32 %v2279_v5  ;;  %v2293_v47 = vmul.f32 1.442695, %v2278_v43  ;;  %v2291_v20 = vmul.f32 1.442695, %v2277_v63 }
 0x71c   :  { %4945 = vpow2.f32 %v2281_v29  ;;  %v2576_v14 = vrot.slane %v2575_v32, 4 }
 0x71d   :  { %4947 = vpow2.f32 %v2283_v1 }
 0x71e   :  { %4949 = vpow2.f32 %v2285_v39  ;;  %v2577_v15 = vmax.f32 %v2575_v32, %v2576_v14 }
 0x71f   :  { %4951 = vpow2.f32 %v2287_v56 }
 0x720   :  { %4953 = vpow2.f32 %v2289_v8  ;;  %v2578_v2 = vrot.slane %v2577_v15, 2 }
 0x721   :  { %4955 = vpow2.f32 %v2293_v47 }
 0x722   :  { %v2579_v18 = vmax.f32 %v2577_v15, %v2578_v2  ;;  %4957 = vpow2.f32 %v2291_v20 }
 0x724   :  { %v2580_v16 = vrot.slane %v2579_v18, 1 }
 0x726   :  { %v2581_v22 = vmax.f32 %v2579_v18, %v2580_v16 }
 0x728   :  { %v5693_v59 = vpop.eup %4943  ;;  %v2582_v48 = vsub.f32 %v5661_v60, %v2581_v22  ;;  %v2583_v6 = vsub.f32 %v5659_v55, %v2581_v22  ;;  %v2584_v53 = vsub.f32 %v5665_v21, %v2581_v22  ;;  %v2585_v50 = vsub.f32 %v5663_v23, %v2581_v22 }
 0x729   :  { %v4946_v62 = vpop.eup %4945  ;;  %v2295_v4 = vsel %vm509_vm4, %v5693_v59, 0.0  ;;  %v2586_v3 = vsub.f32 %v5669_v35, %v2581_v22  ;;  %v2587_v42 = vsub.f32 %v5667_v44, %v2581_v22  ;;  %v2589_v55 = vsub.f32 %v5673_v34, %v2581_v22 }
 0x72a   :  { %v4948_v12 = vpop.eup %4947  ;;  %v2296_v49 = vsel %vm509_vm4, %v4946_v62, 0.0  ;;  %v2590_v19 = vmul.f32 1.442695, %v2582_v48  ;;  %v2592_v45 = vmul.f32 1.442695, %v2583_v6  ;;  %v2588_v35 = vsub.f32 %v5681_v61, %v2581_v22 }
 0x72b   :  { %v4950_v30 = vpop.eup %4949  ;;  %v2297_v27 = vadd.f32 %v2296_v49, %v2295_v4  ;;  %v2298_v31 = vsel %vm509_vm4, %v4948_v12, 0.0  ;;  %v2594_v21 = vmul.f32 1.442695, %v2584_v53  ;;  %v2596_v40 = vmul.f32 1.442695, %v2585_v50  ;;  %v6051_v53 = vld [vmem:[#allocation17_spill] sm:$0xff] }
 0x72c   :  { %v4952_v60 = vpop.eup %4951  ;;  %v2300_v29 = vsel %vm509_vm4, %v4950_v30, 0.0  ;;  %4959 = vpow2.f32 %v2590_v19  ;;  %v2598_v41 = vmul.f32 1.442695, %v2586_v3  ;;  %v2600_v43 = vmul.f32 1.442695, %v2587_v42 }
 0x72d   :  { %v2299_v24 = vadd.f32 %v2298_v31, %v2297_v27  ;;  %v4954_v5 = vpop.eup %4953  ;;  %4961 = vpow2.f32 %v2592_v45  ;;  %v2302_v44 = vsel %vm509_vm4, %v4952_v60, 0.0  ;;  %v2604_v34 = vmul.f32 1.442695, %v2589_v55 }
 0x72e   :  { %v4956_v23 = vpop.eup %4955  ;;  %4963 = vpow2.f32 %v2594_v21  ;;  %v2304_v63 = vsel %vm509_vm4, %v4954_v5, 0.0  ;;  %v2602_v8 = vmul.f32 1.442695, %v2588_v35  ;;  %v6052_v21 = vld [vmem:[#allocation18_spill] sm:$0xff] }
 0x72f   :  { %v2301_v1 = vadd.f32 %v2300_v29, %v2299_v24  ;;  %4665 = vmatpush3.msra.mxu1 %v4956_v23  ;;  %v4958_v39 = vpop.eup %4957  ;;  %4965 = vpow2.f32 %v2596_v40  ;;  %v2308_v47 = vsel %vm509_vm4, %v4956_v23, 0.0 }
 0x730   :  { %4666 = vmatprep.subr.mxu1 %v6027_v26  ;;  %4967 = vpow2.f32 %v2598_v41  ;;  %v2306_v61 = vsel %vm509_vm4, %v4958_v39, 0.0 }
 0x731   :  { %v2303_v32 = vadd.f32 %v2302_v44, %v2301_v1  ;;  %4667 = vmatpush3.msra.mxu1 %v4958_v39  ;;  %4969 = vpow2.f32 %v2600_v43  ;;  %v2911_v39 = vpop.permute.xlu1 %2910 }
 0x732   :  { %4668 = vmatprep.subr.mxu1 %v6027_v26  ;;  %4971 = vpow2.f32 %v2604_v34 }
 0x733   :  { %v2305_v56 = vadd.f32 %v2304_v63, %v2303_v32  ;;  %4669 = vmatpush3.msra.mxu1 %v4954_v5  ;;  %4973 = vpow2.f32 %v2602_v8 }
 0x734   :  { %4670 = vmatprep.subr.mxu1 %v6027_v26 }
 0x735   :  { %v2307_v14 = vadd.f32 %v2306_v61, %v2305_v56  ;;  %4671 = vmatpush3.msra.mxu1 %v4952_v60  ;;  %v2893_v34 = vpop.trf.xlu1 }
 0x736   :  { %4672 = vmatprep.subr.mxu1 %v6027_v26 }
 0x737   :  { %v2309_v15 = vadd.f32 %v2308_v47, %v2307_v14  ;;  %4673 = vmatpush3.msra.mxu1 %v4950_v30 }
 0x738   :  { %4674 = vmatprep.subr.mxu1 %v6027_v26 }
 0x739   :  { %4675 = vmatpush3.msra.mxu1 %v4948_v12  ;;  %v4960_v20 = vpop.eup %4959  ;;  %v2310_v41 = vrot.slane %v2309_v15, 4  ;;  %v2894_v56 = vpop.trf.xlu1 }
 0x73a   :  { %4676 = vmatprep.subr.mxu1 %v6027_v26  ;;  %v4962_v2 = vpop.eup %4961  ;;  %v2606_v18 = vsel %vm509_vm4, %v4960_v20, 0.0 }
 0x73b   :  { %4677 = vmatpush3.msra.mxu1 %v4946_v62  ;;  %v4964_v16 = vpop.eup %4963  ;;  %v2607_v22 = vsel %vm509_vm4, %v4962_v2, 0.0  ;;  %v2311_v44 = vadd.f32 %v2310_v41, %v2309_v15 }
 0x73c   :  { %4678 = vmatprep.subr.mxu1 %v6027_v26  ;;  %v4966_v4 = vpop.eup %4965  ;;  %v2608_v48 = vadd.f32 %v2607_v22, %v2606_v18  ;;  %v2609_v6 = vsel %vm509_vm4, %v4964_v16, 0.0 }
 0x73d   :  { %4679 = vmatpush3.msra.mxu1 %v5693_v59  ;;  %v4968_v12 = vpop.eup %4967  ;;  %v2611_v50 = vsel %vm509_vm4, %v4966_v4, 0.0  ;;  %v2312_v43 = vrot.slane %v2311_v44, 2  ;;  %v2895_v61 = vpop.trf.xlu1 }
 0x73e   :  { %4681 = vmatmul.mubr.msk.f32.vlgmr.msra.gmra.mxu1 %vm509_vm4, %v6051_v53  ;;  %4697 = vmatprep.subr.mxu1 %v6027_v26  ;;  %v2610_v49 = vadd.f32 %v2609_v6, %v2608_v48  ;;  %v4970_v62 = vpop.eup %4969  ;;  %v2613_v3 = vsel %vm509_vm4, %v4968_v12, 0.0  ;;  %v3293_v53 = vpop.trf.xlu0 }
 0x73f   :  { %4713 = vmatprep.mubr.msk.f32.mxu1 %vm5048_vm3, %v6027_v26  ;;  %v4972_v30 = vpop.eup %4971  ;;  %v2615_v42 = vsel %vm509_vm4, %v4970_v62, 0.0  ;;  %v2313_v32 = vadd.f32 %v2312_v43, %v2311_v44 }
 0x740   :  { %v2612_v27 = vadd.f32 %v2611_v50, %v2610_v49  ;;  %4698 = vmatpush3.msra.mxu1 %v4972_v30  ;;  %v4974_v59 = vpop.eup %4973  ;;  %v2619_v24 = vsel %vm509_vm4, %v4972_v30, 0.0 }
 0x741   :  { %4699 = vmatprep.subr.mxu1 %v6027_v26  ;;  %v2617_v45 = vsel %vm509_vm4, %v4974_v59, 0.0  ;;  %v2314_v63 = vrot.slane %v2313_v32, 1  ;;  %v2896_v47 = vpop.trf.xlu1 }
 0x742   :  { %v2614_v31 = vadd.f32 %v2613_v3, %v2612_v27  ;;  %4700 = vmatpush3.msra.mxu1 %v4974_v59  ;;  %v3294_v30 = vpop.trf.xlu0 }
 0x743   :  { %4701 = vmatprep.subr.mxu1 %v6027_v26  ;;  %v2315_v8 = vadd.f32 %v2314_v63, %v2313_v32 }
 0x744   :  { %v2616_v19 = vadd.f32 %v2615_v42, %v2614_v31  ;;  %4702 = vmatpush3.msra.mxu1 %v4970_v62 }
 0x745   :  { %4703 = vmatprep.subr.mxu1 %v6027_v26  ;;  %4975 = vrcp.f32 %v2315_v8  ;;  %v2897_v15 = vpop.trf.xlu1 }
 0x746   :  { %v2618_v60 = vadd.f32 %v2617_v45, %v2616_v19  ;;  %4704 = vmatpush3.msra.mxu1 %v4968_v12 }
 0x747   :  { %4705 = vmatprep.subr.mxu1 %v6027_v26 }
 0x748   :  { %v2620_v55 = vadd.f32 %v2619_v24, %v2618_v60  ;;  %4706 = vmatpush3.msra.mxu1 %v4966_v4 }
 0x749   :  { %4707 = vmatprep.subr.mxu1 %v6027_v26  ;;  %v2898_v48 = vpop.trf.xlu1 }
 0x74a   :  { %4708 = vmatpush3.msra.mxu1 %v4964_v16 }
 0x74b   :  { %4709 = vmatprep.subr.mxu1 %v6027_v26 }
 0x74c   :  { %4710 = vmatpush3.msra.mxu1 %v4962_v2 }
 0x74d   :  { %4711 = vmatprep.subr.mxu1 %v6027_v26  ;;  %v2899_v6 = vpop.trf.xlu1 }
 0x74e   :  { %4712 = vmatpush3.msra.mxu1 %v4960_v20 }
 0x74f   :  { %4714 = vmatmul.mubr.msk.f32.vlgmr.msra.gmra.mxu1 %vm509_vm4, %v6052_v21 }
 0x750   :  { %4726 = vmatprep.mubr.msk.f32.mxu1 %vm379_vm2, %v5288_v33  ;;  %v2621_v33 = vrot.slane %v2620_v55, 4 }
 0x751   :  { %v2900_v49 = vpop.trf.xlu1 }
 0x752   :  { %v4976_v2 = vpop.eup %4975 }
 0x7b6   :  { %v4646_v40 = vpop.f32.mrf.mxu1 }
 0x7b7   :  { %v5745_v5 = vadd.f32 %v4646_v40, %v5626_v52  ;;  %v2622_v52 = vadd.f32 %v2621_v33, %v2620_v55 }
 0x7b8   :  { %v2058_v29 = vpop.f32.mrf.mxu1 }
 0x7b9   :  { %v5748_v23 = vadd.f32 %v2058_v29, %v5629_v58  ;;  %v2623_v14 = vrot.slane %v2622_v52, 2 }
 0x7ba   :  { %v4649_v1 = vpop.f32.mrf.mxu1 }
 0x7bb   :  { %v5751_v35 = vadd.f32 %v4649_v1, %v5632_v46  ;;  %v2624_v58 = vadd.f32 %v2623_v14, %v2622_v52 }
 0x7bc   :  { %v5753_v20 = vpop.f32.mrf.mxu1 }
 0x7bd   :  { %v2625_v46 = vrot.slane %v2624_v58, 1 }
 0x7bf   :  { %v2626_v4 = vadd.f32 %v2625_v46, %v2624_v58 }
 0x7c1   :  { %4977 = vrcp.f32 %v2626_v4 }
 0x7ce   :  { %v4978_v12 = vpop.eup %4977 }
 0x7fe   :  { %v2386_v18 = vpop.f32.mrf.mxu1 }
 0x7ff   :  { %v2391_v16 = vmul.f32 %v4976_v2, %v2386_v18 }
 0x800   :  { %v4682_v22 = vpop.f32.mrf.mxu1 }
 0x801   :  { %4724 = vmatprep.subr.mxu1 %v2391_v16 }
 0x802   :  { %4725 = vmatpush3.msra.mxu1 %v2391_v16 }
 0x803   :  { %4727 = vmatmul.mubr.msk.f32.vlgmr.msra.gmra.mxu1 %vm379_vm2, %v5290_v36  ;;  %4746 = vmatprep.subr.mxu1 %v6027_v26 }
 0x804   :  { %4729 = vmatprep.mubr.msk.f32.mxu1 %vm379_vm2, %v5292_v37  ;;  %v3311_v37 = vpop.permute.xlu1 %3310 }
 0x807   :  { %4730 = vmatmul.mubr.msk.f32.gmra.mxu1 %vm379_vm2, %v5294_v38  ;;  %v3295_v38 = vpop.trf.xlu0 }
 0x808   :  { %4762 = vmatprep.mubr.msk.f32.mxu1 %vm5048_vm3, %v6027_v26 }
 0x80b   :  { %v3296_v27 = vpop.trf.xlu0 }
 0x80f   :  { %v2697_v62 = vpop.f32.mrf.mxu1 }
 0x810   :  { %v2702_v50 = vmul.f32 %v4978_v12, %v2697_v62 }
 0x811   :  { %v4715_v36 = vpop.f32.mrf.mxu1 }
 0x812   :  { %4716 = vmatprep.subr.mxu0 %v2702_v50 }
 0x813   :  { %4717 = vmatpush3.msra.mxu0 %v2702_v50 }
 0x814   :  { %4719 = vmatmul.mubr.msk.f32.vlgmr.msra.gmra.mxu0 %vm379_vm2, %v5239_v9  ;;  %4732 = vmatprep.subr.mxu0 %v2911_v39  ;;  %v3297_v9 = vpop.trf.xlu0 }
 0x815   :  { %4721 = vmatprep.mubr.msk.f32.mxu0 %vm379_vm2, %v5241_v10  ;;  %4733 = vmatpush3.msra.mxu0 %v2911_v39 }
 0x816   :  { %4773 = vmatprep.subr.mxu0 %v3311_v37 }
 0x818   :  { %4722 = vmatmul.mubr.msk.f32.gmra.mxu0 %vm379_vm2, %v5243_v11  ;;  %v3298_v10 = vpop.trf.xlu0 }
 0x819   :  { %4734 = vmatprep.mubr.msk.f32.mxu0 %vm379_vm2, %v2893_v34 }
 0x81c   :  { %4735 = vmatmul.mubr.msk.f32.vlgmr.msra.gmra.mxu0 %vm379_vm2, %v2894_v56  ;;  %v3299_v11 = vpop.trf.xlu0 }
 0x81d   :  { %4774 = vmatpush3.msra.mxu0 %v3311_v37  ;;  %4737 = vmatprep.mubr.msk.f32.mxu0 %vm379_vm2, %v2895_v61 }
 0x820   :  { %4738 = vmatmul.mubr.msk.f32.gmra.mxu0 %vm379_vm2, %v2896_v47  ;;  %v3300_v3 = vpop.trf.xlu0 }
 0x821   :  { %4740 = vmatprep.mubr.msk.f32.mxu0 %vm379_vm2, %v2897_v15 }
 0x824   :  { %4741 = vmatmul.mubr.msk.f32.gmra.mxu0 %vm379_vm2, %v2898_v48 }
 0x825   :  { %4743 = vmatprep.mubr.msk.f32.mxu0 %vm379_vm2, %v2899_v6 }
 0x828   :  { %4744 = vmatmul.mubr.msk.f32.gmra.mxu0 %vm379_vm2, %v2900_v49 }
 0x829   :  { %4775 = vmatprep.mubr.msk.f32.mxu0 %vm379_vm2, %v3293_v53 }
 0x82c   :  { %4776 = vmatmul.mubr.msk.f32.vlgmr.msra.gmra.mxu0 %vm379_vm2, %v3294_v30 }
 0x82d   :  { %4778 = vmatprep.mubr.msk.f32.mxu0 %vm379_vm2, %v3295_v38 }
 0x830   :  { %4779 = vmatmul.mubr.msk.f32.gmra.mxu0 %vm379_vm2, %v3296_v27 }
 0x831   :  { %4781 = vmatprep.mubr.msk.f32.mxu0 %vm379_vm2, %v3297_v9 }
 0x834   :  { %4782 = vmatmul.mubr.msk.f32.gmra.mxu0 %vm379_vm2, %v3298_v10 }
 0x835   :  { %4784 = vmatprep.mubr.msk.f32.mxu0 %vm379_vm2, %v3299_v11 }
 0x838   :  { %4785 = vmatmul.mubr.msk.f32.gmra.mxu0 %vm379_vm2, %v3300_v3 }
 0x839   :  { %4808 = vmatprep.mubr.msk.f32.mxu0 %vm379_vm2, %v5390_v17 }
 0x8c3   :  { %v4728_v59 = vpop.f32.mrf.mxu1 }
 0x8c5   :  { %v2854_v31 = vpop.f32.mrf.mxu1 }
 0x8c7   :  { %v4731_v24 = vpop.f32.mrf.mxu1 }
 0x8d4   :  { %v4720_v42 = vpop.f32.mrf.mxu0 }
 0x8d5   :  { %v5788_v19 = vadd.f32 %v4728_v59, %v4720_v42 }
 0x8d6   :  { %v2769_v45 = vpop.f32.mrf.mxu0 }
 0x8d7   :  { %v5790_v60 = vadd.f32 %v2854_v31, %v2769_v45 }
 0x8d8   :  { %v4723_v55 = vpop.f32.mrf.mxu0 }
 0x8d9   :  { %v5792_v21 = vadd.f32 %v4731_v24, %v4723_v55 }
 0x8da   :  { %v5794_v40 = vpop.f32.mrf.mxu0 }
 0x8dc   :  { %v4736_v29 = vpop.f32.mrf.mxu0 }
 0x8dd   :  { %v3043_v52 = vsel %vm509_vm4, %v4736_v29, -inf }
 0x8de   :  { %v3003_v1 = vpop.f32.mrf.mxu0 }
 0x8df   :  { %v3042_v34 = vsel %vm509_vm4, %v3003_v1, -inf }
 0x8e0   :  { %v4739_v41 = vpop.f32.mrf.mxu0 }
 0x8e1   :  { %v3045_v61 = vsel %vm509_vm4, %v4739_v41, -inf }
 0x8e2   :  { %v3013_v44 = vpop.f32.mrf.mxu0 }
 0x8e3   :  { %v3044_v14 = vsel %vm509_vm4, %v3013_v44, -inf }
 0x8e4   :  { %v4742_v43 = vpop.f32.mrf.mxu0 }
 0x8e5   :  { %v3048_v63 = vsel %vm509_vm4, %v4742_v43, -inf }
 0x8e6   :  { %v3023_v17 = vpop.f32.mrf.mxu0  ;;  %v3049_v47 = vmax.f32 %v3043_v52, %v3048_v63 }
 0x8e7   :  { %v3046_v39 = vsel %vm509_vm4, %v3023_v17, -inf }
 0x8e8   :  { %v4745_v32 = vpop.f32.mrf.mxu0  ;;  %v3047_v56 = vmax.f32 %v3042_v34, %v3046_v39 }
 0x8e9   :  { %v3052_v33 = vsel %vm509_vm4, %v4745_v32, -inf }
 0x8ea   :  { %v3033_v8 = vpop.f32.mrf.mxu0  ;;  %v3053_v46 = vmax.f32 %v3045_v61, %v3052_v33  ;;  %v3054_v18 = vmax.f32 %v3047_v56, %v3049_v47 }
 0x8eb   :  { %v3050_v58 = vsel %vm509_vm4, %v3033_v8, -inf }
 0x8ec   :  { %v3051_v2 = vmax.f32 %v3044_v14, %v3050_v58 }
 0x8ee   :  { %v3055_v15 = vmax.f32 %v3051_v2, %v3053_v46 }
 0x8f0   :  { %v3056_v16 = vmax.f32 %v3054_v18, %v3055_v15  ;;  %v3109_v15 = vpop.permute.xlu0 %3108 }
 0x8f2   :  { %v3057_v22 = vrot.slane %v3056_v16, 4 }
 0x8f4   :  { %v3058_v4 = vmax.f32 %v3056_v16, %v3057_v22  ;;  %v6053_v16 = vld [vmem:[#allocation13_spill] sm:$0xff]  ;;  %v4777_v22 = vpop.f32.mrf.mxu0 }
 0x8f6   :  { %v3059_v48 = vrot.slane %v3058_v4, 2 }
 0x8f8   :  { %v3060_v6 = vmax.f32 %v3058_v4, %v3059_v48  ;;  %v3403_v4 = vpop.f32.mrf.mxu0 }
 0x8fa   :  { %v3061_v53 = vrot.slane %v3060_v6, 1  ;;  %v4780_v48 = vpop.f32.mrf.mxu0 }
 0x8fc   :  { %v3062_v12 = vmax.f32 %v3060_v6, %v3061_v53  ;;  %v3413_v6 = vpop.f32.mrf.mxu0 }
 0x8fe   :  { %v3063_v49 = vsub.f32 %v3003_v1, %v3062_v12  ;;  %v3064_v62 = vsub.f32 %v4736_v29, %v3062_v12  ;;  %v3065_v50 = vsub.f32 %v3013_v44, %v3062_v12  ;;  %v3066_v36 = vsub.f32 %v4739_v41, %v3062_v12  ;;  %v4783_v53 = vpop.f32.mrf.mxu0 }
 0x8ff   :  { %v3067_v30 = vsub.f32 %v3023_v17, %v3062_v12  ;;  %v3068_v37 = vsub.f32 %v4742_v43, %v3062_v12  ;;  %v3070_v10 = vsub.f32 %v4745_v32, %v3062_v12  ;;  %v3069_v3 = vsub.f32 %v3033_v8, %v3062_v12 }
 0x900   :  { %v3071_v38 = vmul.f32 1.442695, %v3063_v49  ;;  %v3073_v27 = vmul.f32 1.442695, %v3064_v62  ;;  %v3075_v9 = vmul.f32 1.442695, %v3065_v50  ;;  %v3423_v12 = vpop.f32.mrf.mxu0 }
 0x901   :  { %v3077_v11 = vmul.f32 1.442695, %v3066_v36  ;;  %v3079_v59 = vmul.f32 1.442695, %v3067_v30  ;;  %v3081_v31 = vmul.f32 1.442695, %v3068_v37 }
 0x902   :  { %4979 = vpow2.f32 %v3071_v38  ;;  %v3085_v42 = vmul.f32 1.442695, %v3070_v10  ;;  %v3083_v45 = vmul.f32 1.442695, %v3069_v3  ;;  %v4786_v49 = vpop.f32.mrf.mxu0  ;;  %v3443_v50 = vsel %vm509_vm4, %v4777_v22, -inf }
 0x903   :  { %4981 = vpow2.f32 %v3073_v27  ;;  %v3442_v36 = vsel %vm509_vm4, %v3403_v4, -inf  ;;  %v3445_v30 = vsel %vm509_vm4, %v4780_v48, -inf  ;;  %v3444_v37 = vsel %vm509_vm4, %v3413_v6, -inf }
 0x904   :  { %4983 = vpow2.f32 %v3075_v9  ;;  %v3433_v62 = vpop.f32.mrf.mxu0  ;;  %v3448_v38 = vsel %vm509_vm4, %v4783_v53, -inf  ;;  %v3446_v27 = vsel %vm509_vm4, %v3423_v12, -inf  ;;  %v3452_v9 = vsel %vm509_vm4, %v4786_v49, -inf }
 0x905   :  { %4985 = vpow2.f32 %v3077_v11  ;;  %v3450_v10 = vsel %vm509_vm4, %v3433_v62, -inf  ;;  %v3449_v11 = vmax.f32 %v3443_v50, %v3448_v38  ;;  %v3447_v3 = vmax.f32 %v3442_v36, %v3446_v27  ;;  %v5830_v50 = vpop.f32.mrf.mxu1 }
 0x906   :  { %4987 = vpow2.f32 %v3079_v59  ;;  %v3453_v59 = vmax.f32 %v3445_v30, %v3452_v9  ;;  %v3509_v9 = vpop.permute.xlu1 %3508 }
 0x907   :  { %4989 = vpow2.f32 %v3081_v31  ;;  %v3451_v31 = vmax.f32 %v3444_v37, %v3450_v10 }
 0x908   :  { %4991 = vpow2.f32 %v3085_v42  ;;  %v3454_v42 = vmax.f32 %v3447_v3, %v3449_v11 }
 0x909   :  { %4993 = vpow2.f32 %v3083_v45  ;;  %v3455_v45 = vmax.f32 %v3451_v31, %v3453_v59 }
 0x90f   :  { %v4980_v24 = vpop.eup %4979 }
 0x910   :  { %v4982_v55 = vpop.eup %4981  ;;  %v3087_v29 = vsel %vm509_vm4, %v4980_v24, 0.0 }
 0x911   :  { %v4984_v1 = vpop.eup %4983  ;;  %v3088_v41 = vsel %vm509_vm4, %v4982_v55, 0.0 }
 0x912   :  { %v4986_v44 = vpop.eup %4985  ;;  %v3089_v43 = vadd.f32 %v3088_v41, %v3087_v29  ;;  %v3090_v17 = vsel %vm509_vm4, %v4984_v1, 0.0 }
 0x913   :  { %v4988_v39 = vpop.eup %4987  ;;  %v3092_v63 = vsel %vm509_vm4, %v4986_v44, 0.0 }
 0x914   :  { %v3091_v32 = vadd.f32 %v3090_v17, %v3089_v43  ;;  %v4990_v34 = vpop.eup %4989  ;;  %v3094_v8 = vsel %vm509_vm4, %v4988_v39, 0.0 }
 0x915   :  { %v4992_v33 = vpop.eup %4991  ;;  %v3096_v14 = vsel %vm509_vm4, %v4990_v34, 0.0 }
 0x916   :  { %v3093_v56 = vadd.f32 %v3092_v63, %v3091_v32  ;;  %4747 = vmatpush3.msra.mxu1 %v4992_v33  ;;  %v4994_v52 = vpop.eup %4993  ;;  %v3100_v2 = vsel %vm509_vm4, %v4992_v33, 0.0 }
 0x917   :  { %4748 = vmatprep.subr.mxu1 %v6027_v26  ;;  %v3098_v47 = vsel %vm509_vm4, %v4994_v52, 0.0 }
 0x918   :  { %v3095_v61 = vadd.f32 %v3094_v8, %v3093_v56  ;;  %4749 = vmatpush3.msra.mxu1 %v4994_v52 }
 0x919   :  { %4750 = vmatprep.subr.mxu1 %v6027_v26 }
 0x91a   :  { %v3097_v58 = vadd.f32 %v3096_v14, %v3095_v61  ;;  %4751 = vmatpush3.msra.mxu1 %v4990_v34 }
 0x91b   :  { %4752 = vmatprep.subr.mxu1 %v6027_v26 }
 0x91c   :  { %v3099_v46 = vadd.f32 %v3098_v47, %v3097_v58  ;;  %4753 = vmatpush3.msra.mxu1 %v4988_v39 }
 0x91d   :  { %4754 = vmatprep.subr.mxu1 %v6027_v26 }
 0x91e   :  { %v3101_v18 = vadd.f32 %v3100_v2, %v3099_v46  ;;  %4755 = vmatpush3.msra.mxu1 %v4986_v44 }
 0x91f   :  { %4756 = vmatprep.subr.mxu1 %v6027_v26 }
 0x920   :  { %4757 = vmatpush3.msra.mxu1 %v4984_v1  ;;  %v3102_v29 = vrot.slane %v3101_v18, 4 }
 0x921   :  { %4758 = vmatprep.subr.mxu1 %v6027_v26 }
 0x922   :  { %4759 = vmatpush3.msra.mxu1 %v4982_v55  ;;  %v3103_v41 = vadd.f32 %v3102_v29, %v3101_v18 }
 0x923   :  { %4760 = vmatprep.subr.mxu1 %v6027_v26 }
 0x924   :  { %4761 = vmatpush3.msra.mxu1 %v4980_v24  ;;  %v3456_v24 = vmax.f32 %v3454_v42, %v3455_v45  ;;  %v3104_v43 = vrot.slane %v3103_v41, 2 }
 0x925   :  { %4763 = vmatmul.mubr.msk.f32.vlgmr.msra.gmra.mxu1 %vm509_vm4, %v3109_v15 }
 0x926   :  { %4767 = vmatprep.mubr.msk.f32.mxu1 %vm379_vm2, %v6053_v16  ;;  %v3457_v55 = vrot.slane %v3456_v24, 4  ;;  %v3105_v39 = vadd.f32 %v3104_v43, %v3103_v41 }
 0x928   :  { %v3458_v1 = vmax.f32 %v3456_v24, %v3457_v55  ;;  %v3106_v34 = vrot.slane %v3105_v39, 1 }
 0x92a   :  { %v3459_v44 = vrot.slane %v3458_v1, 2  ;;  %v3107_v33 = vadd.f32 %v3106_v34, %v3105_v39 }
 0x92c   :  { %v3460_v17 = vmax.f32 %v3458_v1, %v3459_v44  ;;  %4995 = vrcp.f32 %v3107_v33 }
 0x92e   :  { %v3461_v32 = vrot.slane %v3460_v17, 1 }
 0x930   :  { %v3462_v63 = vmax.f32 %v3460_v17, %v3461_v32 }
 0x932   :  { %v3470_v56 = vsub.f32 %v4786_v49, %v3462_v63  ;;  %v3469_v8 = vsub.f32 %v3433_v62, %v3462_v63  ;;  %v3468_v52 = vsub.f32 %v4783_v53, %v3462_v63  ;;  %v3467_v14 = vsub.f32 %v3423_v12, %v3462_v63 }
 0x933   :  { %v3466_v47 = vsub.f32 %v4780_v48, %v3462_v63  ;;  %v3465_v2 = vsub.f32 %v3413_v6, %v3462_v63  ;;  %v3464_v15 = vsub.f32 %v4777_v22, %v3462_v63  ;;  %v3463_v36 = vsub.f32 %v3403_v4, %v3462_v63 }
 0x934   :  { %v3485_v61 = vmul.f32 1.442695, %v3470_v56  ;;  %v3483_v58 = vmul.f32 1.442695, %v3469_v8  ;;  %v3481_v46 = vmul.f32 1.442695, %v3468_v52 }
 0x935   :  { %v3479_v18 = vmul.f32 1.442695, %v3467_v14  ;;  %v3477_v16 = vmul.f32 1.442695, %v3466_v47  ;;  %v3475_v30 = vmul.f32 1.442695, %v3465_v2 }
 0x936   :  { %4997 = vpow2.f32 %v3485_v61  ;;  %v3473_v62 = vmul.f32 1.442695, %v3464_v15  ;;  %v3471_v37 = vmul.f32 1.442695, %v3463_v36 }
 0x937   :  { %4999 = vpow2.f32 %v3483_v58  ;;  %v2865_v58 = vadd.f32 %v5830_v50, %v5794_v40 }
 0x938   :  { %5001 = vpow2.f32 %v3481_v46 }
 0x939   :  { %5003 = vpow2.f32 %v3479_v18  ;;  %v4996_v49 = vpop.eup %4995 }
 0x93a   :  { %5005 = vpow2.f32 %v3477_v16 }
 0x93b   :  { %5007 = vpow2.f32 %v3475_v30 }
 0x93c   :  { %5009 = vpow2.f32 %v3473_v62 }
 0x93d   :  { %5011 = vpow2.f32 %v3471_v37  ;;  %v5895_v37 = vld [vmem:[%s5989_s4] sm:$0xff] }
 0x943   :  { %v4998_v6 = vpop.eup %4997 }
 0x944   :  { %v5000_v22 = vpop.eup %4999  ;;  %v3500_v44 = vsel %vm509_vm4, %v4998_v6, 0.0 }
 0x945   :  { %v5002_v4 = vpop.eup %5001  ;;  %v3498_v1 = vsel %vm509_vm4, %v5000_v22, 0.0 }
 0x9e5   :  { %v3178_v53 = vpop.f32.mrf.mxu1 }
 0x9e6   :  { %v3183_v12 = vmul.f32 %v4996_v49, %v3178_v53  ;;  %v5050_v53 = vmov 2  }
 0x9e7   :  { %v4764_v48 = vpop.f32.mrf.mxu1 }
 0x9e8   :  { %4765 = vmatprep.subr.mxu1 %v3183_v12  ;;  %v39_v48 = vld [vmem:[%s5988_s3 + $0x80] sm:$0xff] }
 0x9e9   :  { %4766 = vmatpush3.msra.mxu1 %v3183_v12  ;;  %v5888_v12 = vld [vmem:[%s5989_s4 + $0x8] sm:$0xff] }
 0x9ea   :  { %4768 = vmatmul.mubr.msk.f32.vlgmr.msra.gmra.mxu1 %vm379_vm2, %v6036_v28  ;;  %4787 = vmatprep.subr.mxu1 %v6027_v26  ;;  %v5004_v28 = vpop.eup %5003 }
 0x9eb   :  { %4770 = vmatprep.mubr.msk.f32.mxu1 %vm379_vm2, %v6037_v54  ;;  %4788 = vmatpush3.msra.mxu1 %v4998_v6  ;;  %v5006_v54 = vpop.eup %5005  ;;  %v3494_v24 = vsel %vm509_vm4, %v5004_v28, 0.0  ;;  %v5051_v6 = vmov 3  }
 0x9ec   :  { %4789 = vmatprep.subr.mxu1 %v6027_v26  ;;  %v5008_v38 = vpop.eup %5007  ;;  %v3492_v42 = vsel %vm509_vm4, %v5006_v54, 0.0  ;;  %4864 = vset.pattern.permute.xlu0 %v5051_v6 }
 0x9ed   :  { %4790 = vmatpush3.msra.mxu1 %v5000_v22  ;;  %v5010_v27 = vpop.eup %5009  ;;  %v3490_v59 = vsel %vm509_vm4, %v5008_v38, 0.0 }
 0x9ee   :  { %4771 = vmatmul.mubr.msk.f32.gmra.mxu1 %vm379_vm2, %v6038_v57  ;;  %4791 = vmatprep.subr.mxu1 %v6027_v26  ;;  %v5012_v57 = vpop.eup %5011  ;;  %v3488_v11 = vsel %vm509_vm4, %v5010_v27, 0.0 }
 0x9ef   :  { %4792 = vmatpush3.msra.mxu1 %v5002_v4  ;;  %4803 = vmatprep.mubr.msk.f32.mxu1 %vm5048_vm3, %v6027_v26  ;;  %v3487_v10 = vsel %vm509_vm4, %v5012_v57, 0.0 }
 0x9f0   :  { %4793 = vmatprep.subr.mxu1 %v6027_v26  ;;  %v3489_v3 = vadd.f32 %v3488_v11, %v3487_v10 }
 0x9f1   :  { %4794 = vmatpush3.msra.mxu1 %v5004_v28 }
 0x9f2   :  { %4795 = vmatprep.subr.mxu1 %v6027_v26  ;;  %v3491_v31 = vadd.f32 %v3490_v59, %v3489_v3 }
 0x9f3   :  { %4796 = vmatpush3.msra.mxu1 %v5006_v54  ;;  %v1644_v54 = vadd.f32 %v5634_v0, %v5551_v7  ;;  %v6057_v0 = vld [vmem:[#allocation5_spill] sm:$0xff] }
 0x9f4   :  { %4797 = vmatprep.subr.mxu1 %v6027_v26  ;;  %v3493_v45 = vadd.f32 %v3492_v42, %v3491_v31  ;;  %v6056_v42 = vld [vmem:[#allocation6_spill] sm:$0xff] }
 0x9f5   :  { %4798 = vmatpush3.msra.mxu1 %v5008_v38  ;;  %v2079_v11 = vadd.f32 %v5753_v20, %v1644_v54 }
 0x9f6   :  { %4799 = vmatprep.subr.mxu1 %v6027_v26  ;;  %v3495_v55 = vadd.f32 %v3494_v24, %v3493_v45 }
 0x9f7   :  { %4800 = vmatpush3.msra.mxu1 %v5010_v27  ;;  %v6054_v27 = vld [vmem:[#allocation7_spill] sm:$0xff] }
 0x9f8   :  { %4801 = vmatprep.subr.mxu1 %v6027_v26  ;;  %v3496_v26 = vsel %vm509_vm4, %v5002_v4, 0.0 }
 0x9f9   :  { %4802 = vmatpush3.msra.mxu1 %v5012_v57  ;;  %v3497_v29 = vadd.f32 %v3496_v26, %v3495_v55 }
 0x9fa   :  { %4804 = vmatmul.mubr.msk.f32.vlgmr.msra.gmra.mxu1 %vm509_vm4, %v3509_v9  ;;  %v6055_v9 = vld [vmem:[#allocation8_spill] sm:$0xff] }
 0x9fb   :  { %v3499_v41 = vadd.f32 %v3498_v1, %v3497_v29  ;;  %4822 = vmatprep.mubr.msk.f32.mxu1 %vm185_vm1, %v39_v48 }
 0x9fd   :  { %v3501_v43 = vadd.f32 %v3500_v44, %v3499_v41 }
 0x9ff   :  { %v3502_v17 = vrot.slane %v3501_v43, 4 }
 0xa01   :  { %v3503_v39 = vadd.f32 %v3502_v17, %v3501_v43 }
 0xa03   :  { %v3504_v32 = vrot.slane %v3503_v39, 2 }
 0xa05   :  { %v3505_v34 = vadd.f32 %v3504_v32, %v3503_v39 }
 0xa07   :  { %v3506_v63 = vrot.slane %v3505_v34, 1 }
 0xa09   :  { %v3507_v33 = vadd.f32 %v3506_v63, %v3505_v34 }
 0xa0b   :  { %5013 = vrcp.f32 %v3507_v33 }
 0xa18   :  { %v5014_v18 = vpop.eup %5013 }
 0xaaa   :  { %v4769_v56 = vpop.f32.mrf.mxu1 }
 0xaab   :  { %v3270_v8 = vadd.f32 %v4769_v56, %v5788_v19  ;;  %v5049_v19 = vmov 1  }
 0xaac   :  { %v3250_v52 = vpop.f32.mrf.mxu1  ;;  %4857 = vset.pattern.permute.xlu1 %v5049_v19 }
 0xaad   :  { %v3269_v61 = vadd.f32 %v3250_v52, %v5790_v60 }
 0xaae   :  { %v4772_v14 = vpop.f32.mrf.mxu1 }
 0xaaf   :  { %v3272_v47 = vadd.f32 %v4772_v14, %v5792_v21 }
 0xab0   :  { %v3260_v46 = vpop.f32.mrf.mxu1 }
 0xab1   :  { %v3271_v2 = vadd.f32 %v3260_v46, %v2865_v58 }
 0xaba   :  { %v3578_v15 = vpop.f32.mrf.mxu1 }
 0xabb   :  { %v3583_v16 = vmul.f32 %v5014_v18, %v3578_v15 }
 0xabc   :  { %v4805_v36 = vpop.f32.mrf.mxu1 }
 0xabd   :  { %4806 = vmatprep.subr.mxu0 %v3583_v16 }
 0xabe   :  { %4807 = vmatpush3.msra.mxu0 %v3583_v16 }
 0xabf   :  { %4809 = vmatmul.mubr.msk.f32.vlgmr.msra.gmra.mxu0 %vm379_vm2, %v6048_v51 }
 0xac0   :  { %4811 = vmatprep.mubr.msk.f32.mxu0 %vm379_vm2, %v6049_v25  ;;  %v5875_v25 = vld [vmem:[%s5989_s4 + $0x18] sm:$0xff] }
 0xac3   :  { %4812 = vmatmul.mubr.msk.f32.gmra.mxu0 %vm379_vm2, %v6050_v13  ;;  %v5881_v13 = vld [vmem:[%s5989_s4 + $0x10] sm:$0xff] }
 0xac4   :  { %3781 = vperm.xlu0 %4864, %v5881_v13  }
 0xb7f   :  { %v4810_v60 = vpop.f32.mrf.mxu0 }
 0xb80   :  { %v3670_v21 = vadd.f32 %v4810_v60, %v3270_v8 }
 0xb81   :  { %v3650_v40 = vpop.f32.mrf.mxu0 }
 0xb82   :  { %3679 = vrot.lane.b32.xlu1 %v3670_v21, %s5046_s15  ;;  %v3669_v30 = vadd.f32 %v3650_v40, %v3269_v61 }
 0xb83   :  { %v4813_v50 = vpop.f32.mrf.mxu0 }
 0xb84   :  { %v3672_v51 = vadd.f32 %v4813_v50, %v3272_v47 }
 0xb85   :  { %v3660_v49 = vpop.f32.mrf.mxu0 }
 0xb86   :  { %3677 = vrot.lane.b32.xlu1 %v3669_v30, %s5046_s15  ;;  %v3671_v62 = vadd.f32 %v3660_v49, %v3271_v2 }
 0xb8a   :  { %3681 = vrot.lane.b32.xlu1 %v3671_v62, %s5046_s15 }
 0xb8e   :  { %3683 = vrot.lane.b32.xlu1 %v3672_v51, %s5046_s15 }
 0xb92   :  { %3745 = vperm.xlu1 %4857, %v5875_v25  }
 0xb96   :  { %3741 = vperm.xlu1 %4857, %v5881_v13  }
 0xb9a   :  { %4858 = vset.pattern.permute.xlu1 %v5050_v53 }
 0xb9b   :  { %3765 = vperm.xlu1 %4858, %v5875_v25  }
 0xb9f   :  { %4859 = vset.pattern.permute.xlu1 %v5049_v19 }
 0xba0   :  { %3737 = vperm.xlu1 %4859, %v5888_v12  }
 0xba4   :  { %4860 = vset.pattern.permute.xlu1 %v5050_v53 }
 0xba5   :  { %3761 = vperm.xlu1 %4860, %v5881_v13  }
 0xba9   :  { %4861 = vset.pattern.permute.xlu1 %v5049_v19 }
 0xbaa   :  { %3733 = vperm.xlu1 %4861, %v5895_v37  }
 0xbae   :  { %4862 = vset.pattern.permute.xlu1 %v5050_v53 }
 0xbaf   :  { %3757 = vperm.xlu1 %4862, %v5888_v12  }
 0xbb3   :  { %3753 = vperm.xlu1 %4862, %v5895_v37  }
 0xbb7   :  { %4863 = vset.pattern.permute.xlu1 %v5051_v6 }
 0xbb8   :  { %3785 = vperm.xlu1 %4863, %v5875_v25  }
 0xbbc   :  { %3777 = vperm.xlu1 %4863, %v5888_v12  }
 0xbc0   :  { %3773 = vperm.xlu1 %4863, %v5895_v37  }
 0xbf4   :  { %v3680_v22 = vpop.permute.xlu1 %3679 }
 0xbf5   :  { %v3690_v4 = vsel %vm509_vm4, %v5745_v5, %v3680_v22 }
 0xbf6   :  { %v3694_v57 = vadd.f32 %v3690_v4, %v6054_v27 }
 0xbf8   :  { %v3678_v28 = vpop.permute.xlu1 %3677 }
 0xbf9   :  { %v3689_v38 = vsel %vm509_vm4, %v5748_v23, %v3678_v28 }
 0xbfa   :  { %v3693_v10 = vadd.f32 %v3689_v38, %v6055_v9 }
 0xbfc   :  { %v3697_v3 = vadd.f32 %v3694_v57, %v3693_v10  ;;  %v3682_v59 = vpop.permute.xlu1 %3681 }
 0xbfd   :  { %v3691_v31 = vsel %vm509_vm4, %v2079_v11, %v3682_v59  ;;  %v41_v11 = vld [vmem:[%s5988_s3 + $0x90] sm:$0xff]  ;;  %v43_v59 = vld [vmem:[%s5988_s3 + $0xa0] sm:$0xff] }
 0xbfe   :  { %v3695_v45 = vadd.f32 %v3691_v31, %v6056_v42  ;;  %4836 = vmatprep.mubr.msk.f32.mxu0 %vm185_vm1, %v43_v59  ;;  %v5052_v31 = vmov 4   ;;  %v5053_v42 = vmov 5  }
 0xbff   :  { %4865 = vset.pattern.permute.xlu0 %v5052_v31  ;;  %4866 = vset.pattern.permute.xlu1 %v5052_v31 }
 0xc00   :  { %v3698_v5 = vadd.f32 %v3697_v3, %v3695_v45  ;;  %v3684_v24 = vpop.permute.xlu1 %3683  ;;  %v42_v3 = vld [vmem:[%s5988_s3 + $0x98] sm:$0xff]  ;;  %3890 = vperm.xlu0 %4865, %v5895_v37   ;;  %3894 = vperm.xlu1 %4866, %v5888_v12  }
 0xc01   :  { %v3692_v7 = vsel %vm509_vm4, %v5751_v35, %v3684_v24 }
 0xc02   :  { %v3696_v55 = vadd.f32 %v3692_v7, %v6057_v0 }
 0xc04   :  { %v3699_v23 = vadd.f32 %v3698_v5, %v3696_v55  ;;  %3902 = vperm.xlu0 %4865, %v5875_v25   ;;  %3898 = vperm.xlu1 %4866, %v5881_v13  }
 0xc06   :  { %v3700_v26 = vrot.slane %v3699_v23, 4 }
 0xc08   :  { %v3701_v29 = vadd.f32 %v3700_v26, %v3699_v23  ;;  %4867 = vset.pattern.permute.xlu1 %v5053_v42  ;;  %4868 = vset.pattern.permute.xlu0 %v5053_v42  ;;  %v3782_v23 = vpop.permute.xlu0 %3781 }
 0xc09   :  { %4041 = vperm.xlu1 %4867, %v5895_v37   ;;  %4045 = vperm.xlu0 %4868, %v5888_v12  }
 0xc0a   :  { %v3702_v1 = vrot.slane %v3701_v29, 2 }
 0xc0c   :  { %v3703_v41 = vadd.f32 %v3702_v1, %v3701_v29 }
 0xc0d   :  { %v3746_v61 = vpop.permute.xlu1 %3745  ;;  %4049 = vperm.xlu1 %4867, %v5881_v13  }
 0xc0e   :  { %v3704_v44 = vrot.slane %v3703_v41, 1 }
 0xc10   :  { %v3705_v20 = vadd.f32 %v3704_v44, %v3703_v41 }
 0xc11   :  { %v3742_v46 = vpop.permute.xlu1 %3741  ;;  %4053 = vperm.xlu1 %4867, %v5875_v25  }
 0xc12   :  { %v3707_v43 = vmul.f32 0.03125, %v3705_v20 }
 0xc14   :  { %v3708_v17 = vsub.f32 %v3693_v10, %v3707_v43  ;;  %v3709_v39 = vsub.f32 %v3694_v57, %v3707_v43  ;;  %v3710_v32 = vsub.f32 %v3695_v45, %v3707_v43  ;;  %v3711_v34 = vsub.f32 %v3696_v55, %v3707_v43  ;;  %v40_v10 = vld [vmem:[%s5988_s3 + $0x88] sm:$0xff] }
 0xc15   :  { %v5054_v45 = vmov 6  }
 0xc16   :  { %v3712_v63 = vmul.f32 %v3708_v17, %v3708_v17  ;;  %v3713_v33 = vmul.f32 %v3709_v39, %v3709_v39  ;;  %v3714_v56 = vmul.f32 %v3710_v32, %v3710_v32  ;;  %v3715_v52 = vmul.f32 %v3711_v34, %v3711_v34  ;;  %v3766_v15 = vpop.permute.xlu1 %3765  ;;  %4869 = vset.pattern.permute.xlu0 %v5054_v45 }
 0xc17   :  { %4061 = vperm.xlu0 %4869, %v5895_v37   ;;  %4870 = vset.pattern.permute.xlu1 %v5054_v45 }
 0xc18   :  { %v3716_v8 = vadd.f32 %v3713_v33, %v3712_v63  ;;  %4065 = vperm.xlu1 %4870, %v5888_v12   ;;  %v44_v12 = vld [vmem:[%s5988_s3 + $0xa8] sm:$0xff] }
 0xc1a   :  { %v3717_v35 = vadd.f32 %v3716_v8, %v3714_v56 }
 0xc1b   :  { %v3738_v60 = vpop.permute.xlu1 %3737  ;;  %4073 = vperm.xlu0 %4869, %v5875_v25  }
 0xc1c   :  { %v3718_v14 = vadd.f32 %v3717_v35, %v3715_v52  ;;  %4069 = vperm.xlu1 %4870, %v5881_v13  }
 0xc1e   :  { %v3719_v58 = vrot.slane %v3718_v14, 4 }
 0xc20   :  { %v3720_v47 = vadd.f32 %v3719_v58, %v3718_v14  ;;  %v3762_v40 = vpop.permute.xlu1 %3761 }
 0xc22   :  { %v3721_v2 = vrot.slane %v3720_v47, 2 }
 0xc24   :  { %v3722_v18 = vadd.f32 %v3721_v2, %v3720_v47 }
 0xc25   :  { %v3734_v50 = vpop.permute.xlu1 %3733 }
 0xc26   :  { %v3723_v16 = vrot.slane %v3722_v18, 1 }
 0xc28   :  { %v3724_v36 = vadd.f32 %v3723_v16, %v3722_v18 }
 0xc2a   :  { %v3725_v19 = vmul.f32 0.03125, %v3724_v36  ;;  %v3758_v48 = vpop.permute.xlu1 %3757 }
 0xc2c   :  { %v3726_v21 = vadd.f32 1e-06, %v3725_v19 }
 0xc2e   :  { %5015 = vrsqrt.f32 %v3726_v21  ;;  %v3754_v27 = vpop.permute.xlu1 %3753 }
 0xc33   :  { %v3786_v5 = vpop.permute.xlu1 %3785 }
 0xc37   :  { %v3778_v7 = vpop.permute.xlu1 %3777 }
 0xc3b   :  { %v5016_v30 = vpop.eup %5015  ;;  %v3774_v1 = vpop.permute.xlu1 %3773 }
 0xc3c   :  { %v3731_v49 = vmul.f32 %v5016_v30, %v3711_v34  ;;  %v3730_v62 = vmul.f32 %v5016_v30, %v3710_v32  ;;  %v3729_v51 = vmul.f32 %v5016_v30, %v3709_v39  ;;  %v3728_v53 = vmul.f32 %v5016_v30, %v3708_v17  ;;  %v45_v17 = vld [vmem:[%s5988_s3 + $0xb0] sm:$0xff]  ;;  %v46_v39 = vld [vmem:[%s5988_s3 + $0xb8] sm:$0xff]  ;;  %s5055_s3 = smov [#allocation2]  }
 0xc3d   :  { %s4089_s19 = sshll.u32 %s5055_s3, 4  ;;  %s4090_s19 = int_to_ptr.vmem [resolvable:$true] %s4089_s19 }
 0xc3e   :  { %v3751_v6 = vmul.f32 %v3746_v61, %v3731_v49  ;;  %v3750_v22 = vmul.f32 %v3742_v46, %v3730_v62  ;;  %v3749_v28 = vmul.f32 %v3738_v60, %v3729_v51  ;;  %v3748_v38 = vmul.f32 %v3734_v50, %v3728_v53  ;;  %s5023_s20 = scalar_lea.vmem %s4090_s19, 512  ;;  %p5028_p1 = scmp.lt.s32.totalorder %s4090_s19, %s4090_s19 }
 0xc3f   :  { %p5024_p0 = scmp.ne.s32.totalorder %s4090_s19, %s5023_s20  ;;  %p5029_p2 = scmp.lt.s32.totalorder %s5023_s20, %s5023_s20 }
 0xc40   :  { %v5922_v4 = vadd.f32 %v3766_v15, %v3751_v6  ;;  %v5924_v54 = vadd.f32 %v3762_v40, %v3750_v22  ;;  %v5928_v57 = vadd.f32 %v3758_v48, %v3749_v28  ;;  %v5932_v9 = vadd.f32 %v3754_v27, %v3748_v38 }
 0xc41   :  { %p5030_p3 = por %p5029_p2, %p5028_p1 }
 0xc42   :  { %4814 = vmatprep.subr.mxu1 %v5922_v4 }
 0xc43   :  { %4815 = vmatpush3.msra.mxu1 %v5922_v4  ;;  %p5031_p4 = pnand %p5030_p3, %p5024_p0 }
 0xc44   :  { %4816 = vmatprep.subr.mxu1 %v5924_v54 }
 0xc45   :  { %4817 = vmatpush3.msra.mxu1 %v5924_v54 }
 0xc46   :  { %4818 = vmatprep.subr.mxu1 %v5928_v57 }
 0xc47   :  { %4819 = vmatpush3.msra.mxu1 %v5928_v57 }
 0xc48   :  { %4820 = vmatprep.subr.mxu1 %v5932_v9 }
 0xc49   :  { %4821 = vmatpush3.msra.mxu1 %v5932_v9 }
 0xc4a   :  { %4823 = vmatmul.mubr.msk.f32.vlgmr.msra.gmra.mxu1 %vm185_vm1, %v40_v10 }
 0xc4b   :  { %4825 = vmatprep.mubr.msk.f32.mxu1 %vm185_vm1, %v41_v11 }
 0xc4e   :  { %4826 = vmatmul.mubr.msk.f32.gmra.mxu1 %vm185_vm1, %v42_v3 }
 0xc7b   :  { %v3891_v32 = vpop.permute.xlu0 %3890  ;;  %v3895_v34 = vpop.permute.xlu1 %3894 }
 0xc7f   :  { %v3903_v52 = vpop.permute.xlu0 %3902  ;;  %v3899_v14 = vpop.permute.xlu1 %3898 }
 0xc84   :  { %v4042_v42 = vpop.permute.xlu1 %4041 }
 0xd0a   :  { %v4824_v24 = vpop.f32.mrf.mxu1 }
 0xd0b   :  { %v3872_v37 = vadd.f32 %v4824_v24, %v3778_v7  ;;  %v4050_v24 = vpop.permute.xlu1 %4049  ;;  %v4046_v7 = vpop.permute.xlu0 %4045 }
 0xd0c   :  { %v3866_v0 = vpop.f32.mrf.mxu1 }
 0xd0d   :  { %v3867_v25 = vadd.f32 %v3866_v0, %v3774_v1  ;;  %v3886_v43 = vmax.f32 %v3872_v37, 0.0 }
 0xd0e   :  { %v4827_v55 = vpop.f32.mrf.mxu1 }
 0xd0f   :  { %v3882_v26 = vadd.f32 %v4827_v55, %v3786_v5  ;;  %v3885_v13 = vmax.f32 %v3867_v25, 0.0  ;;  %v4054_v0 = vpop.permute.xlu1 %4053  ;;  %v4062_v55 = vpop.permute.xlu0 %4061 }
 0xd10   :  { %v3876_v29 = vpop.f32.mrf.mxu1 }
 0xd11   :  { %v3888_v41 = vmax.f32 %v3882_v26, 0.0  ;;  %v3877_v44 = vadd.f32 %v3876_v29, %v3782_v23 }
 0xd13   :  { %v3887_v20 = vmax.f32 %v3877_v44, 0.0  ;;  %4828 = vmatprep.subr.mxu0 %v3888_v41  ;;  %v4066_v23 = vpop.permute.xlu1 %4065 }
 0xd14   :  { %4829 = vmatpush3.msra.mxu0 %v3888_v41 }
 0xd15   :  { %4830 = vmatprep.subr.mxu0 %v3887_v20 }
 0xd16   :  { %4831 = vmatpush3.msra.mxu0 %v3887_v20 }
 0xd17   :  { %4832 = vmatprep.subr.mxu0 %v3886_v43 }
 0xd18   :  { %4833 = vmatpush3.msra.mxu0 %v3886_v43 }
 0xd19   :  { %4834 = vmatprep.subr.mxu0 %v3885_v13 }
 0xd1a   :  { %4835 = vmatpush3.msra.mxu0 %v3885_v13  ;;  %v4074_v13 = vpop.permute.xlu0 %4073 }
 0xd1b   :  { %4837 = vmatmul.mubr.msk.f32.vlgmr.msra.gmra.mxu0 %vm185_vm1, %v44_v12  ;;  %v4070_v12 = vpop.permute.xlu1 %4069 }
 0xd1c   :  { %4839 = vmatprep.mubr.msk.f32.mxu0 %vm185_vm1, %v45_v17 }
 0xd1f   :  { %4840 = vmatmul.mubr.msk.f32.gmra.mxu0 %vm185_vm1, %v46_v39 }
 0xddb   :  { %v4838_v63 = vpop.f32.mrf.mxu0 }
 0xddc   :  { %v3989_v56 = vadd.f32 %v4838_v63, %v3895_v34 }
 0xddd   :  { %v3983_v33 = vpop.f32.mrf.mxu0 }
 0xdde   :  { %v3984_v8 = vadd.f32 %v3983_v33, %v3891_v32  ;;  %v4003_v47 = vadd.f32 %v3989_v56, %v5928_v57 }
 0xddf   :  { %v4841_v35 = vpop.f32.mrf.mxu0 }
 0xde0   :  { %v4002_v61 = vadd.f32 %v3984_v8, %v5932_v9  ;;  %v3999_v46 = vadd.f32 %v4841_v35, %v3903_v52 }
 0xde1   :  { %v3993_v58 = vpop.f32.mrf.mxu0 }
 0xde2   :  { %v3994_v2 = vadd.f32 %v3993_v58, %v3899_v14  ;;  %v4006_v18 = vadd.f32 %v4003_v47, %v4002_v61  ;;  %v4005_v16 = vadd.f32 %v3999_v46, %v5922_v4 }
 0xde4   :  { %v4004_v15 = vadd.f32 %v3994_v2, %v5924_v54 }
 0xde6   :  { %v4007_v36 = vadd.f32 %v4006_v18, %v4004_v15 }
 0xde8   :  { %v4008_v19 = vadd.f32 %v4007_v36, %v4005_v16 }
 0xdea   :  { %v4009_v60 = vrot.slane %v4008_v19, 4 }
 0xdec   :  { %v4010_v21 = vadd.f32 %v4009_v60, %v4008_v19 }
 0xdee   :  { %v4011_v40 = vrot.slane %v4010_v21, 2 }
 0xdf0   :  { %v4012_v50 = vadd.f32 %v4011_v40, %v4010_v21 }
 0xdf2   :  { %v4013_v30 = vrot.slane %v4012_v50, 1 }
 0xdf4   :  { %v4014_v49 = vadd.f32 %v4013_v30, %v4012_v50 }
 0xdf6   :  { %v4015_v62 = vmul.f32 0.03125, %v4014_v49 }
 0xdf8   :  { %v4017_v51 = vsub.f32 %v4003_v47, %v4015_v62  ;;  %v4018_v53 = vsub.f32 %v4004_v15, %v4015_v62  ;;  %v4016_v48 = vsub.f32 %v4002_v61, %v4015_v62  ;;  %v4019_v6 = vsub.f32 %v4005_v16, %v4015_v62 }
 0xdfa   :  { %v4020_v22 = vmul.f32 %v4016_v48, %v4016_v48  ;;  %v4021_v28 = vmul.f32 %v4017_v51, %v4017_v51  ;;  %v4022_v38 = vmul.f32 %v4018_v53, %v4018_v53  ;;  %v4023_v54 = vmul.f32 %v4019_v6, %v4019_v6 }
 0xdfc   :  { %v4024_v27 = vadd.f32 %v4021_v28, %v4020_v22 }
 0xdfe   :  { %v4025_v57 = vadd.f32 %v4024_v27, %v4022_v38 }
 0xe00   :  { %v4026_v4 = vadd.f32 %v4025_v57, %v4023_v54 }
 0xe02   :  { %v4027_v9 = vrot.slane %v4026_v4, 4 }
 0xe04   :  { %v4028_v10 = vadd.f32 %v4027_v9, %v4026_v4 }
 0xe06   :  { %v4029_v11 = vrot.slane %v4028_v10, 2 }
 0xe08   :  { %v4030_v3 = vadd.f32 %v4029_v11, %v4028_v10 }
 0xe0a   :  { %v4031_v59 = vrot.slane %v4030_v3, 1 }
 0xe0c   :  { %v4032_v31 = vadd.f32 %v4031_v59, %v4030_v3 }
 0xe0e   :  { %v4033_v45 = vmul.f32 0.03125, %v4032_v31 }
 0xe10   :  { %v4034_v5 = vadd.f32 1e-06, %v4033_v45 }
 0xe12   :  { %5017 = vrsqrt.f32 %v4034_v5 }
 0xe1f   :  { %v5018_v26 = vpop.eup %5017 }
 0xe20   :  { %v4036_v29 = vmul.f32 %v5018_v26, %v4016_v48  ;;  %v4038_v1 = vmul.f32 %v5018_v26, %v4018_v53  ;;  %v4037_v41 = vmul.f32 %v5018_v26, %v4017_v51  ;;  %v4039_v37 = vmul.f32 %v5018_v26, %v4019_v6 }
 0xe22   :  { %v4056_v44 = vmul.f32 %v4042_v42, %v4036_v29  ;;  %v4058_v20 = vmul.f32 %v4050_v24, %v4038_v1  ;;  %v4057_v25 = vmul.f32 %v4046_v7, %v4037_v41  ;;  %v4059_v43 = vmul.f32 %v4054_v0, %v4039_v37 }
 0xe24   :  { %v4076_v17 = vadd.f32 %v4062_v55, %v4056_v44  ;;  %v4077_v39 = vadd.f32 %v4066_v23, %v4057_v25  ;;  %v4079_v32 = vadd.f32 %v4074_v13, %v4059_v43  ;;  %v4078_v34 = vadd.f32 %v4070_v12, %v4058_v20 }
 0xe26   :  { %4080 = vst [vmem:[#allocation2] sm:$0xff] %v4076_v17  ;;  %4081 = vst [vmem:[#allocation2 + $0x8] sm:$0xff] %v4077_v39 }
 0xe27   :  { %4083 = vst [vmem:[#allocation2 + $0x18] sm:$0xff] %v4079_v32  ;;  %4082 = vst [vmem:[#allocation2 + $0x10] sm:$0xff] %v4078_v34 }
 0xe28   :  { %5034 = shalt.err (!%p5031_p4)
}
 0xe29   :  { %s5056_s21 = smov 128   ;;  %s5057_s22 = smov 8  }
 0xe2a   :  { %4095 = dma.vmem_to_hbm [thread:$0]  %s4090_s19, 512, %s5990_s5, [#allocation3], %s5056_s21, %s5056_s21, %s5057_s22  }
 0xe2b   :  { %5043 = dma.done.wait [#allocation3], 512  }
 0xe2c   :  { %5044 = vsyncadd [#allocation3], 4294966784 }
 0xe2d   :  { %4099 = vsyncpa [#allocation3], 1 }

</bundles_post_ra>
